<compile_context>
chip_gen: v7x
topology: tpu7x:2x2x1
jax: 0.10.0
libtpu: 0.0.40
codegen_flags: <defaults>
</compile_context>

<pallas_src>
import jax
import jax.numpy as jnp
from jax.experimental import pallas as pl
from jax.experimental.pallas import tpu as pltpu

NEG_SLOPE = 0.01                       # torch.nn.LeakyReLU default negative_slope

# Padded (lane/MXU friendly) layer widths.
H1, H2, H3, H4 = 1024, 512, 256, 64    # 1000 -> 1024, 200 -> 256
HEAD_PAD = 128                         # fused actions(4)+parameters(6) heads, lane-dense
N_ACT, N_PAR = 4, 6


def _leaky_relu(x, slope=NEG_SLOPE):
    return jnp.where(x > 0, x, slope * x)


def mlp_kernel(x_ref,
               w1_ref, b1_ref,
               w2_ref, b2_ref,
               w3_ref, b3_ref,
               w4_ref, b4_ref,
               wh_ref, bh_ref,
               out_ref):
    x = x_ref[...]
    h = _leaky_relu(jnp.dot(x, w1_ref[...], preferred_element_type=jnp.float32) + b1_ref[...])
    h = _leaky_relu(jnp.dot(h, w2_ref[...], preferred_element_type=jnp.float32) + b2_ref[...])
    h = _leaky_relu(jnp.dot(h, w3_ref[...], preferred_element_type=jnp.float32) + b3_ref[...])
    h = _leaky_relu(jnp.dot(h, w4_ref[...], preferred_element_type=jnp.float32) + b4_ref[...])
    # Fused output heads -> single MXU push + one lane-dense (width-128) store.
    out_ref[...] = jnp.dot(h, wh_ref[...], preferred_element_type=jnp.float32) + bh_ref[...]


def _round_up(x, m):
    return ((x + m - 1) // m) * m


def neural_net_forward(x, padded_params, *, tile_b=256):
    """Full MLP forward; batch-tiled grid, weights resident in VMEM across grid steps."""
    B, in_dim = x.shape
    tb = min(tile_b, _round_up(B, 8))          # sublane-aligned batch tile
    B_pad = _round_up(B, tb)
    if B_pad != B:
        x = jnp.pad(x, ((0, B_pad - B), (0, 0)))

    grid = (B_pad // tb,)

    def const_map(i):                          # weights: same block every grid step
        return (0, 0)

    weight_specs = [pl.BlockSpec(p.shape, const_map) for p in padded_params]
    in_specs = [pl.BlockSpec((tb, in_dim), lambda i: (i, 0))] + weight_specs
    out_spec = pl.BlockSpec((tb, HEAD_PAD), lambda i: (i, 0))

    out = pl.pallas_call(
        mlp_kernel,
        out_shape=jax.ShapeDtypeStruct((B_pad, HEAD_PAD), jnp.float32),
        grid_spec=pltpu.PrefetchScalarGridSpec(
            num_scalar_prefetch=0,
            grid=grid,
            in_specs=in_specs,
            out_specs=out_spec,
        ),
        compiler_params=pltpu.CompilerParams(
            dimension_semantics=("parallel",),   # shard batch tiles across v7x's 2 TCs
            vmem_limit_bytes=16 << 20,
        ),
    )(x, *padded_params)

    return out[:B, :N_ACT], out[:B, N_ACT:N_ACT + N_PAR]


def init_params(key, input_size):
    """PyTorch-Linear-like init: uniform(-1/sqrt(fan_in), 1/sqrt(fan_in)), true (unpadded) dims."""
    dims = [(input_size, 1000), (1000, 512), (512, 200), (200, 64), (64, 4), (64, 6)]
    params = []
    keys = jax.random.split(key, 2 * len(dims))
    for i, (fan_in, fan_out) in enumerate(dims):
        bound = 1.0 / (fan_in ** 0.5)
        w = jax.random.uniform(keys[2 * i], (fan_in, fan_out), jnp.float32, -bound, bound)
        b = jax.random.uniform(keys[2 * i + 1], (1, fan_out), jnp.float32, -bound, bound)
        params.append(w)
        params.append(b)
    return tuple(params)


def pad_params(params):
    """Zero-pad odd widths (1000->1024, 200->256) and fuse the two heads into (64, 128)."""
    (w1, b1, w2, b2, w3, b3, w4, b4, wa, ba, wp, bp) = params

    def pad_w(w, rows, cols):
        return jnp.pad(w, ((0, rows - w.shape[0]), (0, cols - w.shape[1])))

    def pad_b(b, cols):
        return jnp.pad(b, ((0, 0), (0, cols - b.shape[1])))

    w1p, b1p = pad_w(w1, w1.shape[0], H1), pad_b(b1, H1)
    w2p, b2p = pad_w(w2, H1, H2), pad_b(b2, H2)
    w3p, b3p = pad_w(w3, H2, H3), pad_b(b3, H3)
    w4p, b4p = pad_w(w4, H3, H4), pad_b(b4, H4)

    wh = jnp.zeros((H4, HEAD_PAD), jnp.float32)
    wh = wh.at[:, :N_ACT].set(wa).at[:, N_ACT:N_ACT + N_PAR].set(wp)
    bh = jnp.zeros((1, HEAD_PAD), jnp.float32)
    bh = bh.at[:, :N_ACT].set(ba).at[:, N_ACT:N_ACT + N_PAR].set(bp)

    # TODO(synk): optionally store the large w2 (1000x512) as bf16 to halve HBM traffic
    # at small batch; kept f32 here to preserve the 1e-4 tolerance vs. the f32 reference.
    return (w1p, b1p, w2p, b2p, w3p, b3p, w4p, b4p, wh, bh)


def reference_forward(x, params):
    (w1, b1, w2, b2, w3, b3, w4, b4, wa, ba, wp, bp) = params
    h = _leaky_relu(x @ w1 + b1)
    h = _leaky_relu(h @ w2 + b2)
    h = _leaky_relu(h @ w3 + b3)
    h = _leaky_relu(h @ w4 + b4)
    return h @ wa + ba, h @ wp + bp


if __name__ == "__main__":
    key = jax.random.PRNGKey(0)
    k_x, k_p, k_x2 = jax.random.split(key, 3)

    input_size = 32   # small synthetic feature size (already a clean sub-128 full block)
    params = init_params(k_p, input_size)
    padded = pad_params(params)

    # Small batch: single grid step.
    batch = 8
    x_small = jax.random.normal(k_x, (batch, input_size), jnp.float32)
    out_a, out_p = neural_net_forward(x_small, padded)
    jax.block_until_ready((out_a, out_p))
    ref_a, ref_p = reference_forward(x_small, params)
    assert out_a.shape == (batch, N_ACT)
    assert out_p.shape == (batch, N_PAR)
    assert jnp.allclose(out_a, ref_a, atol=1e-4, rtol=1e-4)
    assert jnp.allclose(out_p, ref_p, atol=1e-4, rtol=1e-4)

    # Larger batch: exercises the batch grid (2 steps of 256 rows); weights are DMA'd once
    # and stay VMEM-resident across steps.
    big = 512
    x_big = jax.random.normal(k_x2, (big, input_size), jnp.float32)
    out_a_b, out_p_b = neural_net_forward(x_big, padded, tile_b=256)
    jax.block_until_ready((out_a_b, out_p_b))
    ref_a_b, ref_p_b = reference_forward(x_big, params)
    assert out_a_b.shape == (big, N_ACT)
    assert out_p_b.shape == (big, N_PAR)
    assert jnp.allclose(out_a_b, ref_a_b, atol=1e-4, rtol=1e-4)
    assert jnp.allclose(out_p_b, ref_p_b, atol=1e-4, rtol=1e-4)

    print("KERNEL_OK")
</pallas_src>

<mosaic_0001>
module attributes {stable_mosaic.version = 11 : i64} {
  func.func @mlp_kernel(%arg0: i32, %arg1: memref<8x32xf32, #tpu.memory_space<vmem>>, %arg2: memref<32x1024xf32, #tpu.memory_space<vmem>>, %arg3: memref<1x1024xf32, #tpu.memory_space<vmem>>, %arg4: memref<1024x512xf32, #tpu.memory_space<vmem>>, %arg5: memref<1x512xf32, #tpu.memory_space<vmem>>, %arg6: memref<512x256xf32, #tpu.memory_space<vmem>>, %arg7: memref<1x256xf32, #tpu.memory_space<vmem>>, %arg8: memref<256x64xf32, #tpu.memory_space<vmem>>, %arg9: memref<1x64xf32, #tpu.memory_space<vmem>>, %arg10: memref<64x128xf32, #tpu.memory_space<vmem>>, %arg11: memref<1x128xf32, #tpu.memory_space<vmem>>, %arg12: memref<8x128xf32, #tpu.memory_space<vmem>>) attributes {dimension_semantics = [#tpu.dimension_semantics<parallel>], iteration_bounds = array<i64: 1>, scalar_prefetch = 0 : i64, scratch_operands = 0 : i64, tpu.core_type = #tpu.core_type<tc>, window_params = [{transform_indices = @transform_0, window_bounds = array<i64: 8, 32>}, {pipeline_mode = #tpu.pipeline_mode<synchronous>, transform_indices = @transform_1, window_bounds = array<i64: 32, 1024>}, {pipeline_mode = #tpu.pipeline_mode<synchronous>, transform_indices = @transform_2, window_bounds = array<i64: 1, 1024>}, {pipeline_mode = #tpu.pipeline_mode<synchronous>, transform_indices = @transform_3, window_bounds = array<i64: 1024, 512>}, {pipeline_mode = #tpu.pipeline_mode<synchronous>, transform_indices = @transform_4, window_bounds = array<i64: 1, 512>}, {pipeline_mode = #tpu.pipeline_mode<synchronous>, transform_indices = @transform_5, window_bounds = array<i64: 512, 256>}, {pipeline_mode = #tpu.pipeline_mode<synchronous>, transform_indices = @transform_6, window_bounds = array<i64: 1, 256>}, {pipeline_mode = #tpu.pipeline_mode<synchronous>, transform_indices = @transform_7, window_bounds = array<i64: 256, 64>}, {pipeline_mode = #tpu.pipeline_mode<synchronous>, transform_indices = @transform_8, window_bounds = array<i64: 1, 64>}, {pipeline_mode = #tpu.pipeline_mode<synchronous>, transform_indices = @transform_9, window_bounds = array<i64: 64, 128>}, {pipeline_mode = #tpu.pipeline_mode<synchronous>, transform_indices = @transform_10, window_bounds = array<i64: 1, 128>}, {transform_indices = @transform_11, window_bounds = array<i64: 8, 128>}]} {
    %c0 = arith.constant 0 : index
    %c0_0 = arith.constant 0 : index
    %0 = vector.load %arg1[%c0, %c0_0] : memref<8x32xf32, #tpu.memory_space<vmem>>, vector<8x32xf32>
    %c0_1 = arith.constant 0 : index
    %c0_2 = arith.constant 0 : index
    %1 = vector.load %arg2[%c0_1, %c0_2] : memref<32x1024xf32, #tpu.memory_space<vmem>>, vector<32x1024xf32>
    %cst = arith.constant dense<0.000000e+00> : vector<8x1024xf32>
    %2 = tpu.matmul %0, %1, %cst {dimension_numbers = #tpu.dot_dimension_numbers<[1], [0], [0], [1], [0, 0, 1, 1], [], []>} : vector<8x32xf32>, vector<32x1024xf32>, vector<8x1024xf32> -> vector<8x1024xf32>
    %c0_3 = arith.constant 0 : index
    %c0_4 = arith.constant 0 : index
    %3 = vector.load %arg3[%c0_3, %c0_4] : memref<1x1024xf32, #tpu.memory_space<vmem>>, vector<1x1024xf32>
    %4 = vector.broadcast %3 : vector<1x1024xf32> to vector<8x1024xf32>
    %5 = arith.addf %2, %4 : vector<8x1024xf32>
    %cst_5 = arith.constant 0.000000e+00 : f32
    %6 = vector.broadcast %cst_5 : f32 to vector<8x1024xf32>
    %7 = arith.cmpf ogt, %5, %6 : vector<8x1024xf32>
    %cst_6 = arith.constant 0.00999999977 : f32
    %8 = vector.broadcast %cst_6 : f32 to vector<8x1024xf32>
    %9 = arith.mulf %8, %5 : vector<8x1024xf32>
    %10 = arith.select %7, %5, %9 : vector<8x1024xi1>, vector<8x1024xf32>
    %c0_7 = arith.constant 0 : index
    %c0_8 = arith.constant 0 : index
    %11 = vector.load %arg4[%c0_7, %c0_8] : memref<1024x512xf32, #tpu.memory_space<vmem>>, vector<1024x512xf32>
    %cst_9 = arith.constant dense<0.000000e+00> : vector<8x512xf32>
    %12 = tpu.matmul %10, %11, %cst_9 {dimension_numbers = #tpu.dot_dimension_numbers<[1], [0], [0], [1], [0, 0, 1, 1], [], []>} : vector<8x1024xf32>, vector<1024x512xf32>, vector<8x512xf32> -> vector<8x512xf32>
    %c0_10 = arith.constant 0 : index
    %c0_11 = arith.constant 0 : index
    %13 = vector.load %arg5[%c0_10, %c0_11] : memref<1x512xf32, #tpu.memory_space<vmem>>, vector<1x512xf32>
    %14 = vector.broadcast %13 : vector<1x512xf32> to vector<8x512xf32>
    %15 = arith.addf %12, %14 : vector<8x512xf32>
    %cst_12 = arith.constant 0.000000e+00 : f32
    %16 = vector.broadcast %cst_12 : f32 to vector<8x512xf32>
    %17 = arith.cmpf ogt, %15, %16 : vector<8x512xf32>
    %cst_13 = arith.constant 0.00999999977 : f32
    %18 = vector.broadcast %cst_13 : f32 to vector<8x512xf32>
    %19 = arith.mulf %18, %15 : vector<8x512xf32>
    %20 = arith.select %17, %15, %19 : vector<8x512xi1>, vector<8x512xf32>
    %c0_14 = arith.constant 0 : index
    %c0_15 = arith.constant 0 : index
    %21 = vector.load %arg6[%c0_14, %c0_15] : memref<512x256xf32, #tpu.memory_space<vmem>>, vector<512x256xf32>
    %cst_16 = arith.constant dense<0.000000e+00> : vector<8x256xf32>
    %22 = tpu.matmul %20, %21, %cst_16 {dimension_numbers = #tpu.dot_dimension_numbers<[1], [0], [0], [1], [0, 0, 1, 1], [], []>} : vector<8x512xf32>, vector<512x256xf32>, vector<8x256xf32> -> vector<8x256xf32>
    %c0_17 = arith.constant 0 : index
    %c0_18 = arith.constant 0 : index
    %23 = vector.load %arg7[%c0_17, %c0_18] : memref<1x256xf32, #tpu.memory_space<vmem>>, vector<1x256xf32>
    %24 = vector.broadcast %23 : vector<1x256xf32> to vector<8x256xf32>
    %25 = arith.addf %22, %24 : vector<8x256xf32>
    %cst_19 = arith.constant 0.000000e+00 : f32
    %26 = vector.broadcast %cst_19 : f32 to vector<8x256xf32>
    %27 = arith.cmpf ogt, %25, %26 : vector<8x256xf32>
    %cst_20 = arith.constant 0.00999999977 : f32
    %28 = vector.broadcast %cst_20 : f32 to vector<8x256xf32>
    %29 = arith.mulf %28, %25 : vector<8x256xf32>
    %30 = arith.select %27, %25, %29 : vector<8x256xi1>, vector<8x256xf32>
    %c0_21 = arith.constant 0 : index
    %c0_22 = arith.constant 0 : index
    %31 = vector.load %arg8[%c0_21, %c0_22] : memref<256x64xf32, #tpu.memory_space<vmem>>, vector<256x64xf32>
    %cst_23 = arith.constant dense<0.000000e+00> : vector<8x64xf32>
    %32 = tpu.matmul %30, %31, %cst_23 {dimension_numbers = #tpu.dot_dimension_numbers<[1], [0], [0], [1], [0, 0, 1, 1], [], []>} : vector<8x256xf32>, vector<256x64xf32>, vector<8x64xf32> -> vector<8x64xf32>
    %c0_24 = arith.constant 0 : index
    %c0_25 = arith.constant 0 : index
    %33 = vector.load %arg9[%c0_24, %c0_25] : memref<1x64xf32, #tpu.memory_space<vmem>>, vector<1x64xf32>
    %34 = vector.broadcast %33 : vector<1x64xf32> to vector<8x64xf32>
    %35 = arith.addf %32, %34 : vector<8x64xf32>
    %cst_26 = arith.constant 0.000000e+00 : f32
    %36 = vector.broadcast %cst_26 : f32 to vector<8x64xf32>
    %37 = arith.cmpf ogt, %35, %36 : vector<8x64xf32>
    %cst_27 = arith.constant 0.00999999977 : f32
    %38 = vector.broadcast %cst_27 : f32 to vector<8x64xf32>
    %39 = arith.mulf %38, %35 : vector<8x64xf32>
    %40 = arith.select %37, %35, %39 : vector<8x64xi1>, vector<8x64xf32>
    %c0_28 = arith.constant 0 : index
    %c0_29 = arith.constant 0 : index
    %41 = vector.load %arg10[%c0_28, %c0_29] : memref<64x128xf32, #tpu.memory_space<vmem>>, vector<64x128xf32>
    %cst_30 = arith.constant dense<0.000000e+00> : vector<8x128xf32>
    %42 = tpu.matmul %40, %41, %cst_30 {dimension_numbers = #tpu.dot_dimension_numbers<[1], [0], [0], [1], [0, 0, 1, 1], [], []>} : vector<8x64xf32>, vector<64x128xf32>, vector<8x128xf32> -> vector<8x128xf32>
    %c0_31 = arith.constant 0 : index
    %c0_32 = arith.constant 0 : index
    %43 = vector.load %arg11[%c0_31, %c0_32] : memref<1x128xf32, #tpu.memory_space<vmem>>, vector<1x128xf32>
    %44 = vector.broadcast %43 : vector<1x128xf32> to vector<8x128xf32>
    %45 = arith.addf %42, %44 : vector<8x128xf32>
    %c0_33 = arith.constant 0 : index
    %c0_34 = arith.constant 0 : index
    %46 = vector.load %arg12[%c0_33, %c0_34] : memref<8x128xf32, #tpu.memory_space<vmem>>, vector<8x128xf32>
    tpu.vector_store %arg12[%c0_33, %c0_34], %45 {strides = array<i32>} : memref<8x128xf32, #tpu.memory_space<vmem>>, vector<8x128xf32>,
    return
  }
  func.func @transform_0(%arg0: i32) -> (i32, i32) {
    %c0_i32 = arith.constant 0 : i32
    %c0_i32_0 = arith.constant 0 : i32
    return %arg0, %c0_i32 : i32, i32
  }
  func.func @transform_1(%arg0: i32) -> (i32, i32) {
    %c0_i32 = arith.constant 0 : i32
    %c0_i32_0 = arith.constant 0 : i32
    %c0_i32_1 = arith.constant 0 : i32
    return %c0_i32, %c0_i32_0 : i32, i32
  }
  func.func @transform_2(%arg0: i32) -> (i32, i32) {
    %c0_i32 = arith.constant 0 : i32
    %c0_i32_0 = arith.constant 0 : i32
    %c0_i32_1 = arith.constant 0 : i32
    return %c0_i32, %c0_i32_0 : i32, i32
  }
  func.func @transform_3(%arg0: i32) -> (i32, i32) {
    %c0_i32 = arith.constant 0 : i32
    %c0_i32_0 = arith.constant 0 : i32
    %c0_i32_1 = arith.constant 0 : i32
    return %c0_i32, %c0_i32_0 : i32, i32
  }
  func.func @transform_4(%arg0: i32) -> (i32, i32) {
    %c0_i32 = arith.constant 0 : i32
    %c0_i32_0 = arith.constant 0 : i32
    %c0_i32_1 = arith.constant 0 : i32
    return %c0_i32, %c0_i32_0 : i32, i32
  }
  func.func @transform_5(%arg0: i32) -> (i32, i32) {
    %c0_i32 = arith.constant 0 : i32
    %c0_i32_0 = arith.constant 0 : i32
    %c0_i32_1 = arith.constant 0 : i32
    return %c0_i32, %c0_i32_0 : i32, i32
  }
  func.func @transform_6(%arg0: i32) -> (i32, i32) {
    %c0_i32 = arith.constant 0 : i32
    %c0_i32_0 = arith.constant 0 : i32
    %c0_i32_1 = arith.constant 0 : i32
    return %c0_i32, %c0_i32_0 : i32, i32
  }
  func.func @transform_7(%arg0: i32) -> (i32, i32) {
    %c0_i32 = arith.constant 0 : i32
    %c0_i32_0 = arith.constant 0 : i32
    %c0_i32_1 = arith.constant 0 : i32
    return %c0_i32, %c0_i32_0 : i32, i32
  }
  func.func @transform_8(%arg0: i32) -> (i32, i32) {
    %c0_i32 = arith.constant 0 : i32
    %c0_i32_0 = arith.constant 0 : i32
    %c0_i32_1 = arith.constant 0 : i32
    return %c0_i32, %c0_i32_0 : i32, i32
  }
  func.func @transform_9(%arg0: i32) -> (i32, i32) {
    %c0_i32 = arith.constant 0 : i32
    %c0_i32_0 = arith.constant 0 : i32
    %c0_i32_1 = arith.constant 0 : i32
    return %c0_i32, %c0_i32_0 : i32, i32
  }
  func.func @transform_10(%arg0: i32) -> (i32, i32) {
    %c0_i32 = arith.constant 0 : i32
    %c0_i32_0 = arith.constant 0 : i32
    %c0_i32_1 = arith.constant 0 : i32
    return %c0_i32, %c0_i32_0 : i32, i32
  }
  func.func @transform_11(%arg0: i32) -> (i32, i32) {
    %c0_i32 = arith.constant 0 : i32
    %c0_i32_0 = arith.constant 0 : i32
    return %arg0, %c0_i32 : i32, i32
  }
}

</mosaic_0001>

<bundles_post_ra>
// kernel: tpu_custom_call.1
= control target key start
LH: loop header
LB: loop body
LE: loop exit
PB: predicated region body
PF: predicated region fallthrough
CT: control target
= control target key end

     0   :  { %16 = vsyncpa [#allocation3], 0  ;;  %s3670_s0 = inlined_call_operand.hbm [shape: f32[8,32], index: 0, kind: input, shape index: {}]   ;;  %s3671_s1 = inlined_call_operand.hbm [shape: f32[32,1024], index: 1, kind: input, shape index: {}]   ;;  %s3672_s2 = inlined_call_operand.hbm [shape: f32[1,1024], index: 2, kind: input, shape index: {}]   ;;  %s3673_s3 = inlined_call_operand.hbm [shape: f32[1024,512], index: 3, kind: input, shape index: {}]   ;;  %s3674_s4 = inlined_call_operand.hbm [shape: f32[1,512], index: 4, kind: input, shape index: {}]   ;;  %s3675_s5 = inlined_call_operand.hbm [shape: f32[512,256], index: 5, kind: input, shape index: {}]   ;;  %s3676_s6 = inlined_call_operand.hbm [shape: f32[1,256], index: 6, kind: input, shape index: {}]   ;;  %s3677_s7 = inlined_call_operand.vmem [shape: f32[256,64], index: 7, kind: input, shape index: {}]   ;;  %s3678_s8 = inlined_call_operand.hbm [shape: f32[1,64], index: 8, kind: input, shape index: {}]   ;;  %s3679_s9 = inlined_call_operand.hbm [shape: f32[64,128], index: 9, kind: input, shape index: {}]   ;;  %s3680_s10 = inlined_call_operand.hbm [shape: f32[1,128], index: 10, kind: input, shape index: {}]   ;;  %s3681_s11 = inlined_call_operand.hbm [shape: f32[8,128], index: 11, kind: output, shape index: {}]  }
   0x1   :  { %17 = vsyncpa [#allocation6], 0 }
   0x2   :  { %18 = vsyncpa [#allocation9], 0 }
   0x3   :  { %19 = vsyncpa [#allocation12], 0 }
   0x4   :  { %20 = vsyncpa [#allocation15], 0 }
   0x5   :  { %21 = vsyncpa [#allocation18], 0 }
   0x6   :  { %22 = vsyncpa [#allocation4], 0  ;;  %s3259_s17 = smov [#allocation5]   ;;  %s3003_s21 = scalar_lea.hbm %s3671_s1, 4096 }
   0x7   :  { %s38_s18 = sshll.u32 %s3259_s17, 4  ;;  %p3004_p0 = scmp.ne.s32.totalorder %s3671_s1, %s3003_s21  ;;  %s39_s18 = int_to_ptr.vmem [resolvable:$true] %s38_s18 }
   0x8   :  { %p3007_p1 = scmp.lt.u32.totalorder %s3003_s21, %s3671_s1 }
   0xa   :  { %p3009_p2 = pnand %p3007_p1, %p3004_p0 }
   0xc   :  { %3012 = shalt.err (!%p3009_p2)
}
   0xd   :  { %s3013_s26 = scalar_lea.vmem %s39_s18, 4096  ;;  %p3018_p4 = scmp.lt.s32.totalorder %s39_s18, %s39_s18 }
   0xe   :  { %p3014_p3 = scmp.ne.s32.totalorder %s39_s18, %s3013_s26  ;;  %p3019_p5 = scmp.lt.s32.totalorder %s3013_s26, %s3013_s26 }
  0x10   :  { %p3020_p6 = por %p3019_p5, %p3018_p4 }
  0x12   :  { %p3021_p7 = pnand %p3020_p6, %p3014_p3 }
  0x14   :  { %3024 = shalt.err (!%p3021_p7)
}
  0x15   :  { %s3260_s27 = smov 1024   ;;  %s3261_s28 = smov 64  }
  0x16   :  { %44 = dma.hbm_to_vmem [thread:$0]  %s3671_s1, 4096, %s39_s18, [#allocation6], %s3260_s27, %s3260_s27, %s3261_s28  }
  0x17   :  { %s3262_s12 = smov [#allocation8]   ;;  %s3025_s16 = scalar_lea.hbm %s3673_s3, 65536 }
  0x18   :  { %s60_s13 = sshll.u32 %s3262_s12, 4  ;;  %p3026_p8 = scmp.ne.s32.totalorder %s3673_s3, %s3025_s16  ;;  %s61_s13 = int_to_ptr.vmem [resolvable:$true] %s60_s13 }
  0x19   :  { %p3029_p9 = scmp.lt.u32.totalorder %s3025_s16, %s3673_s3 }
  0x1b   :  { %p3031_p10 = pnand %p3029_p9, %p3026_p8 }
  0x1d   :  { %3034 = shalt.err (!%p3031_p10)
}
  0x1e   :  { %s3035_s22 = scalar_lea.vmem %s61_s13, 65536  ;;  %p3040_p12 = scmp.lt.s32.totalorder %s61_s13, %s61_s13 }
  0x1f   :  { %p3036_p11 = scmp.ne.s32.totalorder %s61_s13, %s3035_s22  ;;  %p3041_p13 = scmp.lt.s32.totalorder %s3035_s22, %s3035_s22 }
  0x21   :  { %p3042_p0 = por %p3041_p13, %p3040_p12 }
  0x23   :  { %p3043_p1 = pnand %p3042_p0, %p3036_p11 }
  0x25   :  { %3046 = shalt.err (!%p3043_p1)
}
  0x26   :  { %s3263_s1 = smov 512   ;;  %s3264_s18 = smov 32  }
  0x27   :  { %66 = dma.hbm_to_vmem [thread:$0]  %s3673_s3, 65536, %s61_s13, [#allocation9], %s3263_s1, %s3263_s1, %s3264_s18  }
  0x28   :  { %s3265_s25 = smov [#allocation11]   ;;  %s3047_s29 = scalar_lea.hbm %s3675_s5, 16384 }
  0x29   :  { %s82_s26 = sshll.u32 %s3265_s25, 4  ;;  %p3048_p2 = scmp.ne.s32.totalorder %s3675_s5, %s3047_s29  ;;  %s83_s26 = int_to_ptr.vmem [resolvable:$true] %s82_s26 }
  0x2a   :  { %p3051_p3 = scmp.lt.u32.totalorder %s3047_s29, %s3675_s5 }
  0x2c   :  { %p3053_p4 = pnand %p3051_p3, %p3048_p2 }
  0x2e   :  { %3056 = shalt.err (!%p3053_p4)
}
  0x2f   :  { %s3057_s16 = scalar_lea.vmem %s83_s26, 16384  ;;  %p3062_p6 = scmp.lt.s32.totalorder %s83_s26, %s83_s26 }
  0x30   :  { %p3058_p5 = scmp.ne.s32.totalorder %s83_s26, %s3057_s16  ;;  %p3063_p7 = scmp.lt.s32.totalorder %s3057_s16, %s3057_s16 }
  0x32   :  { %p3064_p8 = por %p3063_p7, %p3062_p6 }
  0x34   :  { %p3065_p9 = pnand %p3064_p8, %p3058_p5 }
  0x36   :  { %3068 = shalt.err (!%p3065_p9)
}
  0x37   :  { %s3266_s3 = smov 256   ;;  %s3267_s13 = smov 16  }
  0x38   :  { %88 = dma.hbm_to_vmem [thread:$0]  %s3675_s5, 16384, %s83_s26, [#allocation12], %s3266_s3, %s3266_s3, %s3267_s13  }
  0x39   :  { %s3268_s20 = smov [#allocation14]   ;;  %s3269_s22 = smov [#allocation2]  }
  0x3a   :  { %s107_s21 = sshll.u32 %s3268_s20, 4  ;;  %s29_s1 = sshll.u32 %s3269_s22, 4  ;;  %s108_s21 = int_to_ptr.vmem [resolvable:$true] %s107_s21  ;;  %s30_s1 = int_to_ptr.vmem [resolvable:$true] %s29_s1 }
  0x3b   :  { %s3069_s24 = scalar_lea.hbm %s3678_s8, 16 }
  0x3c   :  { %p3070_p10 = scmp.ne.s32.totalorder %s3678_s8, %s3069_s24  ;;  %p3073_p11 = scmp.lt.u32.totalorder %s3069_s24, %s3678_s8 }
  0x3e   :  { %p3075_p12 = pnand %p3073_p11, %p3070_p10 }
  0x40   :  { %3078 = shalt.err (!%p3075_p12)
}
  0x41   :  { %s3079_s5 = scalar_lea.vmem %s108_s21, 16  ;;  %s3083_s26 = scalar_lea.vmem %s108_s21, 32 }
  0x42   :  { %p3080_p13 = scmp.ne.s32.totalorder %s108_s21, %s3079_s5  ;;  %p3084_p0 = scmp.lt.s32.totalorder %s108_s21, %s108_s21 }
  0x43   :  { %p3085_p1 = scmp.lt.s32.totalorder %s3083_s26, %s3079_s5 }
  0x45   :  { %p3086_p2 = por %p3085_p1, %p3084_p0 }
  0x47   :  { %p3087_p3 = pnand %p3086_p2, %p3080_p13 }
  0x49   :  { %3090 = shalt.err (!%p3087_p3)
}
  0x4a   :  { %110 = dma.hbm_to_vmem [thread:$0]  %s3678_s8, 16, %s108_s21, [#allocation15]  }
  0x4b   :  { %s3091_s16 = scalar_lea.hbm %s3670_s0, 128 }
  0x4c   :  { %p3092_p4 = scmp.ne.s32.totalorder %s3670_s0, %s3091_s16  ;;  %p3095_p5 = scmp.lt.u32.totalorder %s3091_s16, %s3670_s0 }
  0x4e   :  { %p3097_p6 = pnand %p3095_p5, %p3092_p4 }
  0x50   :  { %3100 = shalt.err (!%p3097_p6)
}
  0x51   :  { %s3101_s20 = scalar_lea.vmem %s30_s1, 128  ;;  %p3106_p8 = scmp.lt.s32.totalorder %s30_s1, %s30_s1 }
  0x52   :  { %p3102_p7 = scmp.ne.s32.totalorder %s30_s1, %s3101_s20  ;;  %p3107_p9 = scmp.lt.s32.totalorder %s3101_s20, %s3101_s20 }
  0x54   :  { %p3108_p10 = por %p3107_p9, %p3106_p8 }
  0x56   :  { %p3109_p11 = pnand %p3108_p10, %p3102_p7 }
  0x58   :  { %3112 = shalt.err (!%p3109_p11)
}
  0x59   :  { %32 = dma.hbm_to_vmem [thread:$0]  %s3670_s0, 128, %s30_s1, [#allocation3]  }
  0x5a   :  { %s3270_s22 = smov [#allocation7]   ;;  %s3271_s23 = smov [#allocation10]  }
  0x5b   :  { %s51_s18 = sshll.u32 %s3270_s22, 4  ;;  %s73_s24 = sshll.u32 %s3271_s23, 4  ;;  %s52_s18 = int_to_ptr.vmem [resolvable:$true] %s51_s18  ;;  %s74_s24 = int_to_ptr.vmem [resolvable:$true] %s73_s24 }
  0x5c   :  { %s3113_s28 = scalar_lea.hbm %s3672_s2, 128 }
  0x5d   :  { %p3114_p12 = scmp.ne.s32.totalorder %s3672_s2, %s3113_s28  ;;  %p3117_p13 = scmp.lt.u32.totalorder %s3113_s28, %s3672_s2 }
  0x5f   :  { %p3119_p0 = pnand %p3117_p13, %p3114_p12 }
  0x61   :  { %3122 = shalt.err (!%p3119_p0)
}
  0x62   :  { %s3123_s0 = scalar_lea.vmem %s52_s18, 128  ;;  %p3128_p2 = scmp.lt.s32.totalorder %s52_s18, %s52_s18 }
  0x63   :  { %p3124_p1 = scmp.ne.s32.totalorder %s52_s18, %s3123_s0  ;;  %p3129_p3 = scmp.lt.s32.totalorder %s3123_s0, %s3123_s0 }
  0x65   :  { %p3130_p4 = por %p3129_p3, %p3128_p2 }
  0x67   :  { %p3131_p5 = pnand %p3130_p4, %p3124_p1 }
  0x69   :  { %3134 = shalt.err (!%p3131_p5)
}
  0x6a   :  { %54 = dma.hbm_to_vmem [thread:$0]  %s3672_s2, 128, %s52_s18, [#allocation6]  }
  0x6b   :  { %s3135_s16 = scalar_lea.hbm %s3674_s4, 64 }
  0x6c   :  { %p3136_p6 = scmp.ne.s32.totalorder %s3674_s4, %s3135_s16  ;;  %p3139_p7 = scmp.lt.u32.totalorder %s3135_s16, %s3674_s4 }
  0x6e   :  { %p3141_p8 = pnand %p3139_p7, %p3136_p6 }
  0x70   :  { %3144 = shalt.err (!%p3141_p8)
}
  0x71   :  { %s3145_s20 = scalar_lea.vmem %s74_s24, 64  ;;  %p3150_p10 = scmp.lt.s32.totalorder %s74_s24, %s74_s24 }
  0x72   :  { %p3146_p9 = scmp.ne.s32.totalorder %s74_s24, %s3145_s20  ;;  %p3151_p11 = scmp.lt.s32.totalorder %s3145_s20, %s3145_s20 }
  0x74   :  { %p3152_p12 = por %p3151_p11, %p3150_p10 }
  0x76   :  { %p3153_p13 = pnand %p3152_p12, %p3146_p9 }
  0x78   :  { %3156 = shalt.err (!%p3153_p13)
}
  0x79   :  { %76 = dma.hbm_to_vmem [thread:$0]  %s3674_s4, 64, %s74_s24, [#allocation9]  }
  0x7a   :  { %s3272_s21 = smov [#allocation13]   ;;  %s3273_s18 = smov [#allocation16]  }
  0x7b   :  { %s95_s22 = sshll.u32 %s3272_s21, 4  ;;  %s116_s23 = sshll.u32 %s3273_s18, 4  ;;  %s96_s22 = int_to_ptr.vmem [resolvable:$true] %s95_s22  ;;  %s117_s23 = int_to_ptr.vmem [resolvable:$true] %s116_s23 }
  0x7c   :  { %s3157_s28 = scalar_lea.hbm %s3676_s6, 32 }
  0x7d   :  { %p3158_p0 = scmp.ne.s32.totalorder %s3676_s6, %s3157_s28  ;;  %p3161_p1 = scmp.lt.u32.totalorder %s3157_s28, %s3676_s6 }
  0x7f   :  { %p3163_p2 = pnand %p3161_p1, %p3158_p0 }
  0x81   :  { %3166 = shalt.err (!%p3163_p2)
}
  0x82   :  { %s3167_s4 = scalar_lea.vmem %s96_s22, 32  ;;  %p3172_p4 = scmp.lt.s32.totalorder %s96_s22, %s96_s22 }
  0x83   :  { %p3168_p3 = scmp.ne.s32.totalorder %s96_s22, %s3167_s4  ;;  %p3173_p5 = scmp.lt.s32.totalorder %s3167_s4, %s3167_s4 }
  0x85   :  { %p3174_p6 = por %p3173_p5, %p3172_p4 }
  0x87   :  { %p3175_p7 = pnand %p3174_p6, %p3168_p3 }
  0x89   :  { %3178 = shalt.err (!%p3175_p7)
}
  0x8a   :  { %98 = dma.hbm_to_vmem [thread:$0]  %s3676_s6, 32, %s96_s22, [#allocation12]  }
  0x8b   :  { %s3179_s14 = scalar_lea.hbm %s3679_s9, 1024 }
  0x8c   :  { %p3180_p8 = scmp.ne.s32.totalorder %s3679_s9, %s3179_s14  ;;  %p3183_p9 = scmp.lt.u32.totalorder %s3179_s14, %s3679_s9 }
  0x8e   :  { %p3185_p10 = pnand %p3183_p9, %p3180_p8 }
  0x90   :  { %3188 = shalt.err (!%p3185_p10)
}
  0x91   :  { %s3189_s17 = scalar_lea.vmem %s117_s23, 1024  ;;  %p3194_p12 = scmp.lt.s32.totalorder %s117_s23, %s117_s23 }
  0x92   :  { %p3190_p11 = scmp.ne.s32.totalorder %s117_s23, %s3189_s17  ;;  %p3195_p13 = scmp.lt.s32.totalorder %s3189_s17, %s3189_s17 }
  0x94   :  { %p3196_p0 = por %p3195_p13, %p3194_p12 }
  0x96   :  { %p3197_p1 = pnand %p3196_p0, %p3190_p11 }
  0x98   :  { %3200 = shalt.err (!%p3197_p1)
}
  0x99   :  { %s3274_s6 = smov 128   ;;  %s3275_s19 = smov 8  }
  0x9a   :  { %122 = dma.hbm_to_vmem [thread:$0]  %s3679_s9, 1024, %s117_s23, [#allocation15], %s3274_s6, %s3274_s6, %s3275_s19  }
  0x9b   :  { %s3276_s8 = smov [#allocation17]   ;;  %s3201_s25 = scalar_lea.hbm %s3680_s10, 16 }
  0x9c   :  { %s129_s21 = sshll.u32 %s3276_s8, 4  ;;  %p3202_p2 = scmp.ne.s32.totalorder %s3680_s10, %s3201_s25  ;;  %s130_s21 = int_to_ptr.vmem [resolvable:$true] %s129_s21 }
  0x9d   :  { %p3205_p3 = scmp.lt.u32.totalorder %s3201_s25, %s3680_s10 }
  0x9f   :  { %p3207_p4 = pnand %p3205_p3, %p3202_p2 }
  0xa1   :  { %3210 = shalt.err (!%p3207_p4)
}
  0xa2   :  { %s3211_s26 = scalar_lea.vmem %s130_s21, 16  ;;  %s3215_s9 = scalar_lea.vmem %s130_s21, 32 }
  0xa3   :  { %p3212_p5 = scmp.ne.s32.totalorder %s130_s21, %s3211_s26  ;;  %p3216_p6 = scmp.lt.s32.totalorder %s130_s21, %s130_s21 }
  0xa4   :  { %p3217_p7 = scmp.lt.s32.totalorder %s3215_s9, %s3211_s26 }
  0xa6   :  { %p3218_p8 = por %p3217_p7, %p3216_p6 }
  0xa8   :  { %p3219_p9 = pnand %p3218_p8, %p3212_p5 }
  0xaa   :  { %3222 = shalt.err (!%p3219_p9)
}
  0xab   :  { %132 = dma.hbm_to_vmem [thread:$0]  %s3680_s10, 16, %s130_s21, [#allocation18]  }
  0xac   :  { %3245 = dma.done.wait [#allocation3], 128  }
  0xad   :  { %3246 = vsyncadd [#allocation3], 4294967168 }
  0xae   :  { %3247 = dma.done.wait [#allocation6], 4224  }
  0xaf   :  { %3248 = vsyncadd [#allocation6], 4294963072 }
  0xb0   :  { %3249 = dma.done.wait [#allocation9], 65600  }
  0xb1   :  { %3250 = vsyncadd [#allocation9], 4294901696 }
  0xb2   :  { %3251 = dma.done.wait [#allocation12], 16416  }
  0xb3   :  { %3252 = vsyncadd [#allocation12], 4294950880 }
  0xb4   :  { %3253 = dma.done.wait [#allocation15], 1040  }
  0xb5   :  { %3254 = vsyncadd [#allocation15], 4294966256 }
  0xb6   :  { %3255 = dma.done.wait [#allocation18], 16  }
  0xb7   :  { %3256 = vsyncadd [#allocation18], 4294967280  ;;  %v3277_v0 = vmov 0.0   ;;  %v165_v1 = vld [vmem:[#allocation5 + $0x8] sm:$0xff]  ;;  %v164_v3 = vld [vmem:[#allocation5] sm:$0xff]  ;;  %vm238_vm0 = vcmask 261120  }
  0xb8   :  { %306 = vmatprep.mubr.f32.mxu1 %v3277_v0  ;;  %448 = vmatprep.mubr.f32.mxu0 %v3277_v0  ;;  %v173_v2 = vld [vmem:[#allocation5 + $0x48] sm:$0xff]  ;;  %v172_v5 = vld [vmem:[#allocation5 + $0x40] sm:$0xff]  ;;  %v167_v12 = vld [vmem:[#allocation5 + $0x18] sm:$0xff]  ;;  %vm3279_vm15 = vmmov 0  }
  0xb9   :  { %v2244_v4 = vpack.c.bf16 %v173_v2, %v165_v1  ;;  %v181_v6 = vld [vmem:[#allocation5 + $0x88] sm:$0xff]  ;;  %v2246_v8 = vpack.c.bf16 %v172_v5, %v164_v3  ;;  %v180_v10 = vld [vmem:[#allocation5 + $0x80] sm:$0xff]  ;;  %v175_v13 = vld [vmem:[#allocation5 + $0x58] sm:$0xff] }
  0xba   :  { %v189_v7 = vld [vmem:[#allocation5 + $0xc8] sm:$0xff]  ;;  %v188_v11 = vld [vmem:[#allocation5 + $0xc0] sm:$0xff]  ;;  %v166_v15 = vld [vmem:[#allocation5 + $0x10] sm:$0xff]  ;;  %v2252_v17 = vpack.c.bf16 %v175_v13, %v167_v12 }
  0xbb   :  { %v2248_v9 = vpack.c.bf16 %v189_v7, %v181_v6  ;;  %2245 = vmatprep.subr.bf16.mxu1 %v2244_v4  ;;  %v2250_v14 = vpack.c.bf16 %v188_v11, %v180_v10  ;;  %v174_v16 = vld [vmem:[#allocation5 + $0x50] sm:$0xff]  ;;  %v183_v18 = vld [vmem:[#allocation5 + $0x98] sm:$0xff]  ;;  %v169_v20 = vld [vmem:[#allocation5 + $0x28] sm:$0xff] }
  0xbc   :  { %2247 = vmatpush1.bf16.msra.mxu1 %v2246_v8  ;;  %v191_v19 = vld [vmem:[#allocation5 + $0xd8] sm:$0xff]  ;;  %v177_v21 = vld [vmem:[#allocation5 + $0x68] sm:$0xff]  ;;  %v168_v22 = vld [vmem:[#allocation5 + $0x20] sm:$0xff]  ;;  %v2254_v30 = vpack.c.bf16 %v174_v16, %v166_v15 }
  0xbd   :  { %2249 = vmatprep.subr.bf16.mxu1 %v2248_v9  ;;  %v176_v23 = vld [vmem:[#allocation5 + $0x60] sm:$0xff]  ;;  %v2260_v24 = vpack.c.bf16 %v177_v21, %v169_v20  ;;  %v185_v26 = vld [vmem:[#allocation5 + $0xa8] sm:$0xff]  ;;  %v3463_v29 = vld [vmem:[#allocation2] sm:$0xff]  ;;  %v2256_v33 = vpack.c.bf16 %v191_v19, %v183_v18 }
  0xbe   :  { %v2262_v25 = vpack.c.bf16 %v176_v23, %v168_v22  ;;  %v193_v27 = vld [vmem:[#allocation5 + $0xe8] sm:$0xff]  ;;  %v184_v28 = vld [vmem:[#allocation5 + $0xa0] sm:$0xff]  ;;  %v182_v34 = vld [vmem:[#allocation5 + $0x90] sm:$0xff] }
  0xbf   :  { %v2264_v31 = vpack.c.bf16 %v193_v27, %v185_v26  ;;  %v192_v32 = vld [vmem:[#allocation5 + $0xe0] sm:$0xff]  ;;  %v190_v35 = vld [vmem:[#allocation5 + $0xd0] sm:$0xff]  ;;  %2261 = vmatprep.subr.bf16.mxu0 %v2260_v24  ;;  %v171_v37 = vld [vmem:[#allocation5 + $0x38] sm:$0xff] }
  0xc0   :  { %2251 = vmatpush1.bf16.msra.mxu1 %v2250_v14  ;;  %2263 = vmatpush1.bf16.msra.mxu0 %v2262_v25  ;;  %v2266_v36 = vpack.c.bf16 %v192_v32, %v184_v28  ;;  %v179_v38 = vld [vmem:[#allocation5 + $0x78] sm:$0xff]  ;;  %v2258_v39 = vpack.c.bf16 %v190_v35, %v182_v34  ;;  %v170_v41 = vld [vmem:[#allocation5 + $0x30] sm:$0xff]  ;;  %v678_v48 = vld [vmem:[#allocation8 + $0x400] sm:$0xff] }
  0xc1   :  { %2253 = vmatprep.subr.bf16.mxu1 %v2252_v17  ;;  %2265 = vmatprep.subr.bf16.mxu0 %v2264_v31  ;;  %v2268_v40 = vpack.c.bf16 %v179_v38, %v171_v37  ;;  %v178_v42 = vld [vmem:[#allocation5 + $0x70] sm:$0xff]  ;;  %v187_v43 = vld [vmem:[#allocation5 + $0xb8] sm:$0xff]  ;;  %v682_v52 = vld [vmem:[#allocation8 + $0x420] sm:$0xff] }
  0xc2   :  { %v195_v44 = vld [vmem:[#allocation5 + $0xf8] sm:$0xff]  ;;  %v679_v45 = vld [vmem:[#allocation8 + $0x408] sm:$0xff]  ;;  %v2270_v49 = vpack.c.bf16 %v178_v42, %v170_v41  ;;  %v2342_v55 = vpack.c.bf16 %v682_v52, %v678_v48  ;;  %v686_v60 = vld [vmem:[#allocation8 + $0x440] sm:$0xff] }
  0xc3   :  { %2174 = vmatmul.mubr.msk.f32.vlgmr.msra.gmra.mrb[0].mxu1 %vm238_vm0, %v3463_v29  ;;  %v683_v46 = vld [vmem:[#allocation8 + $0x428] sm:$0xff]  ;;  %v2272_v53 = vpack.c.bf16 %v195_v44, %v187_v43  ;;  %v690_v61 = vld [vmem:[#allocation8 + $0x460] sm:$0xff] }
  0xc4   :  { %2255 = vmatpush1.bf16.msra.mxu1 %v2254_v30  ;;  %377 = vmatprep.mubr.f32.mxu1 %v3277_v0  ;;  %v2340_v47 = vpack.c.bf16 %v683_v46, %v679_v45  ;;  %v186_v50 = vld [vmem:[#allocation5 + $0xb0] sm:$0xff]  ;;  %v2346_v62 = vpack.c.bf16 %v690_v61, %v686_v60  ;;  %v550_v2 = vld [vmem:[#allocation8] sm:$0xff] }
  0xc5   :  { %2257 = vmatprep.subr.bf16.mxu1 %v2256_v33  ;;  %2267 = vmatpush1.bf16.msra.mxu0 %v2266_v36  ;;  %v194_v51 = vld [vmem:[#allocation5 + $0xf0] sm:$0xff]  ;;  %v554_v3 = vld [vmem:[#allocation8 + $0x20] sm:$0xff] }
  0xc6   :  { %v551_v54 = vld [vmem:[#allocation8 + $0x8] sm:$0xff]  ;;  %2341 = vmatprep.subr.bf16.mxu0 %v2340_v47  ;;  %v2274_v1 = vpack.c.bf16 %v194_v51, %v186_v50  ;;  %v694_v8 = vld [vmem:[#allocation8 + $0x480] sm:$0xff]  ;;  %v2278_v14 = vpack.c.bf16 %v554_v3, %v550_v2 }
  0xc7   :  { %v687_v56 = vld [vmem:[#allocation8 + $0x448] sm:$0xff]  ;;  %v698_v9 = vld [vmem:[#allocation8 + $0x4a0] sm:$0xff] }
  0xc8   :  { %2259 = vmatpush1.bf16.msra.mxu1 %v2258_v39  ;;  %2176 = vmatmul.mubr.msk.f32.vlgmr.msra.gmra.mrb[0].mxu0 %vm238_vm0, %v3463_v29  ;;  %v691_v57 = vld [vmem:[#allocation8 + $0x468] sm:$0xff]  ;;  %v2350_v13 = vpack.c.bf16 %v698_v9, %v694_v8  ;;  %v558_v15 = vld [vmem:[#allocation8 + $0x40] sm:$0xff] }
  0xc9   :  { %2269 = vmatprep.subr.bf16.mxu1 %v2268_v40  ;;  %v555_v58 = vld [vmem:[#allocation8 + $0x28] sm:$0xff]  ;;  %v2344_v59 = vpack.c.bf16 %v691_v57, %v687_v56  ;;  %2343 = vmatpush1.bf16.msra.mxu0 %v2342_v55  ;;  %v702_v17 = vld [vmem:[#allocation8 + $0x4c0] sm:$0xff] }
  0xca   :  { %v695_v63 = vld [vmem:[#allocation8 + $0x488] sm:$0xff]  ;;  %v2276_v5 = vpack.c.bf16 %v555_v58, %v551_v54  ;;  %v706_v18 = vld [vmem:[#allocation8 + $0x4e0] sm:$0xff] }
  0xcb   :  { %2175 = vmatmul.mubr.msk.f32.vlgmr.msra.gmra.mrb[2].mxu1 %vm238_vm0, %v3463_v29  ;;  %v699_v4 = vld [vmem:[#allocation8 + $0x4a8] sm:$0xff]  ;;  %2345 = vmatprep.subr.bf16.mxu0 %v2344_v59  ;;  %v562_v20 = vld [vmem:[#allocation8 + $0x60] sm:$0xff]  ;;  %v2354_v25 = vpack.c.bf16 %v706_v18, %v702_v17 }
  0xcc   :  { %2271 = vmatpush1.bf16.msra.mxu1 %v2270_v49  ;;  %519 = vmatprep.mubr.f32.mxu1 %v3277_v0  ;;  %v559_v6 = vld [vmem:[#allocation8 + $0x48] sm:$0xff]  ;;  %v2348_v7 = vpack.c.bf16 %v699_v4, %v695_v63  ;;  %v2282_v26 = vpack.c.bf16 %v562_v20, %v558_v15  ;;  %v566_v27 = vld [vmem:[#allocation8 + $0x80] sm:$0xff] }
  0xcd   :  { %2273 = vmatprep.subr.bf16.mxu1 %v2272_v53  ;;  %v563_v10 = vld [vmem:[#allocation8 + $0x68] sm:$0xff]  ;;  %2347 = vmatpush1.bf16.msra.mxu0 %v2346_v62  ;;  %v710_v30 = vld [vmem:[#allocation8 + $0x500] sm:$0xff] }
  0xce   :  { %v703_v11 = vld [vmem:[#allocation8 + $0x4c8] sm:$0xff]  ;;  %2349 = vmatprep.subr.bf16.mxu0 %v2348_v7  ;;  %v2280_v19 = vpack.c.bf16 %v563_v10, %v559_v6  ;;  %v714_v31 = vld [vmem:[#allocation8 + $0x520] sm:$0xff] }
  0xcf   :  { %v707_v12 = vld [vmem:[#allocation8 + $0x4e8] sm:$0xff]  ;;  %v570_v33 = vld [vmem:[#allocation8 + $0xa0] sm:$0xff]  ;;  %v2358_v38 = vpack.c.bf16 %v714_v31, %v710_v30 }
  0xd0   :  { %2275 = vmatpush1.bf16.msra.mxu1 %v2274_v1  ;;  %v2352_v16 = vpack.c.bf16 %v707_v12, %v703_v11  ;;  %v711_v21 = vld [vmem:[#allocation8 + $0x508] sm:$0xff]  ;;  %v574_v39 = vld [vmem:[#allocation8 + $0xc0] sm:$0xff] }
  0xd1   :  { %2277 = vmatprep.subr.bf16.mxu1 %v2276_v5  ;;  %v715_v22 = vld [vmem:[#allocation8 + $0x528] sm:$0xff]  ;;  %2351 = vmatpush1.bf16.msra.mxu0 %v2350_v13  ;;  %v718_v41 = vld [vmem:[#allocation8 + $0x540] sm:$0xff] }
  0xd2   :  { %v567_v23 = vld [vmem:[#allocation8 + $0x88] sm:$0xff]  ;;  %2353 = vmatprep.subr.bf16.mxu0 %v2352_v16  ;;  %v2356_v28 = vpack.c.bf16 %v715_v22, %v711_v21  ;;  %v722_v42 = vld [vmem:[#allocation8 + $0x560] sm:$0xff] }
  0xd3   :  { %v571_v24 = vld [vmem:[#allocation8 + $0xa8] sm:$0xff]  ;;  %2177 = vmatmul.mubr.msk.f32.vlgmr.msra.gmra.mrb[4].mxu1 %vm238_vm0, %v3463_v29  ;;  %v2286_v29 = vpack.c.bf16 %v570_v33, %v566_v27  ;;  %v578_v44 = vld [vmem:[#allocation8 + $0xe0] sm:$0xff]  ;;  %v2362_v49 = vpack.c.bf16 %v722_v42, %v718_v41 }
  0xd4   :  { %2279 = vmatpush1.bf16.msra.mxu1 %v2278_v14  ;;  %v2284_v32 = vpack.c.bf16 %v571_v24, %v567_v23  ;;  %v719_v34 = vld [vmem:[#allocation8 + $0x548] sm:$0xff]  ;;  %v2290_v50 = vpack.c.bf16 %v578_v44, %v574_v39  ;;  %v582_v51 = vld [vmem:[#allocation8 + $0x100] sm:$0xff] }
  0xd5   :  { %2281 = vmatprep.subr.bf16.mxu1 %v2280_v19  ;;  %v723_v35 = vld [vmem:[#allocation8 + $0x568] sm:$0xff]  ;;  %2355 = vmatpush1.bf16.msra.mxu0 %v2354_v25  ;;  %v726_v53 = vld [vmem:[#allocation8 + $0x580] sm:$0xff] }
  0xd6   :  { %v575_v36 = vld [vmem:[#allocation8 + $0xc8] sm:$0xff]  ;;  %2357 = vmatprep.subr.bf16.mxu0 %v2356_v28  ;;  %v2360_v40 = vpack.c.bf16 %v723_v35, %v719_v34  ;;  %v730_v54 = vld [vmem:[#allocation8 + $0x5a0] sm:$0xff] }
  0xd7   :  { %v579_v37 = vld [vmem:[#allocation8 + $0xe8] sm:$0xff]  ;;  %v586_v56 = vld [vmem:[#allocation8 + $0x120] sm:$0xff]  ;;  %v2366_v61 = vpack.c.bf16 %v730_v54, %v726_v53 }
  0xd8   :  { %2283 = vmatpush1.bf16.msra.mxu1 %v2282_v26  ;;  %v2288_v43 = vpack.c.bf16 %v579_v37, %v575_v36  ;;  %v727_v45 = vld [vmem:[#allocation8 + $0x588] sm:$0xff]  ;;  %v2294_v62 = vpack.c.bf16 %v586_v56, %v582_v51  ;;  %v590_v63 = vld [vmem:[#allocation8 + $0x140] sm:$0xff] }
  0xd9   :  { %2285 = vmatprep.subr.bf16.mxu1 %v2284_v32  ;;  %v731_v46 = vld [vmem:[#allocation8 + $0x5a8] sm:$0xff]  ;;  %2359 = vmatpush1.bf16.msra.mxu0 %v2358_v38  ;;  %v734_v2 = vld [vmem:[#allocation8 + $0x5c0] sm:$0xff] }
  0xda   :  { %v583_v47 = vld [vmem:[#allocation8 + $0x108] sm:$0xff]  ;;  %2361 = vmatprep.subr.bf16.mxu0 %v2360_v40  ;;  %v2364_v52 = vpack.c.bf16 %v731_v46, %v727_v45  ;;  %v738_v3 = vld [vmem:[#allocation8 + $0x5e0] sm:$0xff] }
  0xdb   :  { %v587_v48 = vld [vmem:[#allocation8 + $0x128] sm:$0xff]  ;;  %v594_v5 = vld [vmem:[#allocation8 + $0x160] sm:$0xff]  ;;  %v2370_v10 = vpack.c.bf16 %v738_v3, %v734_v2 }
  0xdc   :  { %2287 = vmatpush1.bf16.msra.mxu1 %v2286_v29  ;;  %v2292_v55 = vpack.c.bf16 %v587_v48, %v583_v47  ;;  %v735_v57 = vld [vmem:[#allocation8 + $0x5c8] sm:$0xff]  ;;  %v2298_v11 = vpack.c.bf16 %v594_v5, %v590_v63  ;;  %v598_v12 = vld [vmem:[#allocation8 + $0x180] sm:$0xff] }
  0xdd   :  { %2289 = vmatprep.subr.bf16.mxu1 %v2288_v43  ;;  %v739_v58 = vld [vmem:[#allocation8 + $0x5e8] sm:$0xff]  ;;  %2363 = vmatpush1.bf16.msra.mxu0 %v2362_v49  ;;  %v742_v14 = vld [vmem:[#allocation8 + $0x600] sm:$0xff] }
  0xde   :  { %v591_v59 = vld [vmem:[#allocation8 + $0x148] sm:$0xff]  ;;  %2365 = vmatprep.subr.bf16.mxu0 %v2364_v52  ;;  %v2368_v1 = vpack.c.bf16 %v739_v58, %v735_v57  ;;  %v746_v15 = vld [vmem:[#allocation8 + $0x620] sm:$0xff] }
  0xdf   :  { %v595_v60 = vld [vmem:[#allocation8 + $0x168] sm:$0xff]  ;;  %v602_v17 = vld [vmem:[#allocation8 + $0x1a0] sm:$0xff]  ;;  %v2374_v22 = vpack.c.bf16 %v746_v15, %v742_v14 }
  0xe0   :  { %2291 = vmatpush1.bf16.msra.mxu1 %v2290_v50  ;;  %v2296_v4 = vpack.c.bf16 %v595_v60, %v591_v59  ;;  %v743_v6 = vld [vmem:[#allocation8 + $0x608] sm:$0xff]  ;;  %v2302_v23 = vpack.c.bf16 %v602_v17, %v598_v12  ;;  %v606_v24 = vld [vmem:[#allocation8 + $0x1c0] sm:$0xff] }
  0xe1   :  { %2293 = vmatprep.subr.bf16.mxu1 %v2292_v55  ;;  %v747_v7 = vld [vmem:[#allocation8 + $0x628] sm:$0xff]  ;;  %2367 = vmatpush1.bf16.msra.mxu0 %v2366_v61  ;;  %v750_v26 = vld [vmem:[#allocation8 + $0x640] sm:$0xff] }
  0xe2   :  { %v599_v8 = vld [vmem:[#allocation8 + $0x188] sm:$0xff]  ;;  %2369 = vmatprep.subr.bf16.mxu0 %v2368_v1  ;;  %v2372_v13 = vpack.c.bf16 %v747_v7, %v743_v6  ;;  %v754_v27 = vld [vmem:[#allocation8 + $0x660] sm:$0xff] }
  0xe3   :  { %v603_v9 = vld [vmem:[#allocation8 + $0x1a8] sm:$0xff]  ;;  %v610_v30 = vld [vmem:[#allocation8 + $0x1e0] sm:$0xff]  ;;  %v2378_v35 = vpack.c.bf16 %v754_v27, %v750_v26 }
  0xe4   :  { %2295 = vmatpush1.bf16.msra.mxu1 %v2294_v62  ;;  %v2300_v16 = vpack.c.bf16 %v603_v9, %v599_v8  ;;  %v751_v18 = vld [vmem:[#allocation8 + $0x648] sm:$0xff]  ;;  %v2306_v36 = vpack.c.bf16 %v610_v30, %v606_v24  ;;  %v614_v37 = vld [vmem:[#allocation8 + $0x200] sm:$0xff] }
  0xe5   :  { %2297 = vmatprep.subr.bf16.mxu1 %v2296_v4  ;;  %v755_v19 = vld [vmem:[#allocation8 + $0x668] sm:$0xff]  ;;  %2371 = vmatpush1.bf16.msra.mxu0 %v2370_v10  ;;  %v758_v29 = vld [vmem:[#allocation8 + $0x680] sm:$0xff] }
  0xe6   :  { %v607_v20 = vld [vmem:[#allocation8 + $0x1c8] sm:$0xff]  ;;  %2373 = vmatprep.subr.bf16.mxu0 %v2372_v13  ;;  %v2376_v25 = vpack.c.bf16 %v755_v19, %v751_v18  ;;  %v762_v39 = vld [vmem:[#allocation8 + $0x6a0] sm:$0xff] }
  0xe7   :  { %v611_v21 = vld [vmem:[#allocation8 + $0x1e8] sm:$0xff]  ;;  %v618_v41 = vld [vmem:[#allocation8 + $0x220] sm:$0xff]  ;;  %v2382_v46 = vpack.c.bf16 %v762_v39, %v758_v29 }
  0xe8   :  { %2299 = vmatpush1.bf16.msra.mxu1 %v2298_v11  ;;  %v2304_v28 = vpack.c.bf16 %v611_v21, %v607_v20  ;;  %v759_v31 = vld [vmem:[#allocation8 + $0x688] sm:$0xff]  ;;  %v2310_v47 = vpack.c.bf16 %v618_v41, %v614_v37  ;;  %v622_v48 = vld [vmem:[#allocation8 + $0x240] sm:$0xff] }
  0xe9   :  { %2301 = vmatprep.subr.bf16.mxu1 %v2300_v16  ;;  %v763_v32 = vld [vmem:[#allocation8 + $0x6a8] sm:$0xff]  ;;  %2375 = vmatpush1.bf16.msra.mxu0 %v2374_v22  ;;  %v766_v50 = vld [vmem:[#allocation8 + $0x6c0] sm:$0xff] }
  0xea   :  { %v615_v33 = vld [vmem:[#allocation8 + $0x208] sm:$0xff]  ;;  %2377 = vmatprep.subr.bf16.mxu0 %v2376_v25  ;;  %v2380_v38 = vpack.c.bf16 %v763_v32, %v759_v31  ;;  %v770_v51 = vld [vmem:[#allocation8 + $0x6e0] sm:$0xff] }
  0xeb   :  { %v619_v34 = vld [vmem:[#allocation8 + $0x228] sm:$0xff]  ;;  %v626_v53 = vld [vmem:[#allocation8 + $0x260] sm:$0xff]  ;;  %v2386_v58 = vpack.c.bf16 %v770_v51, %v766_v50 }
  0xec   :  { %2303 = vmatpush1.bf16.msra.mxu1 %v2302_v23  ;;  %v2308_v40 = vpack.c.bf16 %v619_v34, %v615_v33  ;;  %v767_v42 = vld [vmem:[#allocation8 + $0x6c8] sm:$0xff]  ;;  %v2314_v59 = vpack.c.bf16 %v626_v53, %v622_v48  ;;  %v630_v62 = vld [vmem:[#allocation8 + $0x280] sm:$0xff] }
  0xed   :  { %2305 = vmatprep.subr.bf16.mxu1 %v2304_v28  ;;  %v771_v43 = vld [vmem:[#allocation8 + $0x6e8] sm:$0xff]  ;;  %2379 = vmatpush1.bf16.msra.mxu0 %v2378_v35  ;;  %v634_v63 = vld [vmem:[#allocation8 + $0x2a0] sm:$0xff] }
  0xee   :  { %v623_v44 = vld [vmem:[#allocation8 + $0x248] sm:$0xff]  ;;  %2381 = vmatprep.subr.bf16.mxu0 %v2380_v38  ;;  %v2384_v49 = vpack.c.bf16 %v771_v43, %v767_v42  ;;  %v2318_v3 = vpack.c.bf16 %v634_v63, %v630_v62  ;;  %v638_v5 = vld [vmem:[#allocation8 + $0x2c0] sm:$0xff]  ;;  %v553_v43 = vld [vmem:[#allocation8 + $0x18] sm:$0xff] }
  0xef   :  { %v627_v45 = vld [vmem:[#allocation8 + $0x268] sm:$0xff]  ;;  %v642_v6 = vld [vmem:[#allocation8 + $0x2e0] sm:$0xff]  ;;  %v3480_v62 = vld [vmem:[#allocation7] sm:$0xff] }
  0xf0   :  { %2307 = vmatpush1.bf16.msra.mxu1 %v2306_v36  ;;  %v2312_v52 = vpack.c.bf16 %v627_v45, %v623_v44  ;;  %v775_v54 = vld [vmem:[#allocation8 + $0x708] sm:$0xff]  ;;  %v2322_v9 = vpack.c.bf16 %v642_v6, %v638_v5  ;;  %v646_v11 = vld [vmem:[#allocation8 + $0x300] sm:$0xff]  ;;  %v557_v45 = vld [vmem:[#allocation8 + $0x38] sm:$0xff] }
  0xf1   :  { %2309 = vmatprep.subr.bf16.mxu1 %v2308_v40  ;;  %v779_v55 = vld [vmem:[#allocation8 + $0x728] sm:$0xff]  ;;  %2383 = vmatpush1.bf16.msra.mxu0 %v2382_v46  ;;  %v650_v12 = vld [vmem:[#allocation8 + $0x320] sm:$0xff]  ;;  %v2532_v48 = vpack.c.bf16 %v557_v45, %v553_v43  ;;  %v577_v43 = vld [vmem:[#allocation8 + $0xd8] sm:$0xff] }
  0xf2   :  { %v631_v56 = vld [vmem:[#allocation8 + $0x288] sm:$0xff]  ;;  %2385 = vmatprep.subr.bf16.mxu0 %v2384_v49  ;;  %v2388_v60 = vpack.c.bf16 %v779_v55, %v775_v54  ;;  %v2326_v15 = vpack.c.bf16 %v650_v12, %v646_v11  ;;  %v654_v17 = vld [vmem:[#allocation8 + $0x340] sm:$0xff] }
  0xf3   :  { %v635_v57 = vld [vmem:[#allocation8 + $0x2a8] sm:$0xff]  ;;  %v658_v18 = vld [vmem:[#allocation8 + $0x360] sm:$0xff] }
  0xf4   :  { %2311 = vmatpush1.bf16.msra.mxu1 %v2310_v47  ;;  %v2316_v61 = vpack.c.bf16 %v635_v57, %v631_v56  ;;  %v639_v1 = vld [vmem:[#allocation8 + $0x2c8] sm:$0xff]  ;;  %v2330_v21 = vpack.c.bf16 %v658_v18, %v654_v17  ;;  %v662_v23 = vld [vmem:[#allocation8 + $0x380] sm:$0xff] }
  0xf5   :  { %2313 = vmatprep.subr.bf16.mxu1 %v2312_v52  ;;  %v643_v2 = vld [vmem:[#allocation8 + $0x2e8] sm:$0xff]  ;;  %2387 = vmatpush1.bf16.msra.mxu0 %v2386_v58  ;;  %v666_v24 = vld [vmem:[#allocation8 + $0x3a0] sm:$0xff] }
  0xf6   :  { %2389 = vmatprep.subr.bf16.mxu0 %v2388_v60  ;;  %v2320_v4 = vpack.c.bf16 %v643_v2, %v639_v1  ;;  %v647_v7 = vld [vmem:[#allocation8 + $0x308] sm:$0xff]  ;;  %v774_v25 = vld [vmem:[#allocation8 + $0x700] sm:$0xff]  ;;  %v2334_v26 = vpack.c.bf16 %v666_v24, %v662_v23  ;;  %v564_v23 = vld [vmem:[#allocation8 + $0x70] sm:$0xff] }
  0xf7   :  { %v651_v8 = vld [vmem:[#allocation8 + $0x328] sm:$0xff]  ;;  %v778_v27 = vld [vmem:[#allocation8 + $0x720] sm:$0xff] }
  0xf8   :  { %2315 = vmatpush1.bf16.msra.mxu1 %v2314_v59  ;;  %v2324_v10 = vpack.c.bf16 %v651_v8, %v647_v7  ;;  %v655_v13 = vld [vmem:[#allocation8 + $0x348] sm:$0xff]  ;;  %v2390_v28 = vpack.c.bf16 %v778_v27, %v774_v25  ;;  %v670_v35 = vld [vmem:[#allocation8 + $0x3c0] sm:$0xff]  ;;  %v198_v59 = vlaneseq  ;;  %v573_v27 = vld [vmem:[#allocation8 + $0xb8] sm:$0xff] }
  0xf9   :  { %2317 = vmatprep.subr.bf16.mxu1 %v2316_v61  ;;  %v659_v14 = vld [vmem:[#allocation8 + $0x368] sm:$0xff]  ;;  %v674_v36 = vld [vmem:[#allocation8 + $0x3e0] sm:$0xff] }
  0xfa   :  { %v2328_v16 = vpack.c.bf16 %v659_v14, %v655_v13  ;;  %v663_v19 = vld [vmem:[#allocation8 + $0x388] sm:$0xff]  ;;  %2391 = vmatpush1.bf16.msra.mxu0 %v2390_v28  ;;  %v2338_v38 = vpack.c.bf16 %v674_v36, %v670_v35  ;;  %v782_v29 = vld [vmem:[#allocation8 + $0x740] sm:$0xff]  ;;  %v3475_v60 = vshrl.u32 %v198_v59, 7  ;;  %v561_v13 = vld [vmem:[#allocation8 + $0x58] sm:$0xff] }
  0xfb   :  { %v667_v20 = vld [vmem:[#allocation8 + $0x3a8] sm:$0xff]  ;;  %v786_v39 = vld [vmem:[#allocation8 + $0x760] sm:$0xff]  ;;  %v565_v14 = vld [vmem:[#allocation8 + $0x78] sm:$0xff] }
  0xfc   :  { %2319 = vmatpush1.bf16.msra.mxu1 %v2318_v3  ;;  %v2332_v22 = vpack.c.bf16 %v667_v20, %v663_v19  ;;  %v671_v30 = vld [vmem:[#allocation8 + $0x3c8] sm:$0xff]  ;;  %v2394_v40 = vpack.c.bf16 %v786_v39, %v782_v29  ;;  %v790_v46 = vld [vmem:[#allocation8 + $0x780] sm:$0xff]  ;;  %v3478_v61 = vsub.s32 0, %v3475_v60  ;;  %v3483_v63 = vsub.s32 1, %v3475_v60  ;;  %v568_v29 = vld [vmem:[#allocation8 + $0x90] sm:$0xff] }
  0xfd   :  { %2321 = vmatprep.subr.bf16.mxu1 %v2320_v4  ;;  %v675_v31 = vld [vmem:[#allocation8 + $0x3e8] sm:$0xff]  ;;  %v794_v47 = vld [vmem:[#allocation8 + $0x7a0] sm:$0xff]  ;;  %v220_v4 = vsub.s32 5, %v3475_v60  ;;  %v208_v7 = vsub.s32 2, %v3475_v60  ;;  %v212_v11 = vsub.s32 3, %v3475_v60  ;;  %v572_v39 = vld [vmem:[#allocation8 + $0xb0] sm:$0xff] }
  0xfe   :  { %v783_v32 = vld [vmem:[#allocation8 + $0x748] sm:$0xff]  ;;  %v2336_v33 = vpack.c.bf16 %v675_v31, %v671_v30  ;;  %v2398_v49 = vpack.c.bf16 %v794_v47, %v790_v46  ;;  %v798_v53 = vld [vmem:[#allocation8 + $0x7c0] sm:$0xff]  ;;  %v201_v1 = vrot.slane %v3480_v62, %v3478_v61  ;;  %v205_v2 = vrot.slane %v3480_v62, %v3483_v63  ;;  %v585_v59 = vld [vmem:[#allocation8 + $0x118] sm:$0xff] }
  0xff   :  { %v787_v34 = vld [vmem:[#allocation8 + $0x768] sm:$0xff]  ;;  %v802_v54 = vld [vmem:[#allocation8 + $0x7e0] sm:$0xff]  ;;  %v209_v17 = vrot.slane %v3480_v62, %v208_v7  ;;  %v213_v20 = vrot.slane %v3480_v62, %v212_v11 }
 0x100   :  { %2323 = vmatpush1.bf16.msra.mxu1 %v2322_v9  ;;  %v2392_v37 = vpack.c.bf16 %v787_v34, %v783_v32  ;;  %v791_v41 = vld [vmem:[#allocation8 + $0x788] sm:$0xff]  ;;  %v2402_v55 = vpack.c.bf16 %v802_v54, %v798_v53  ;;  %v552_v9 = vld [vmem:[#allocation8 + $0x10] sm:$0xff]  ;;  %v806_v35 = vld [vmem:[#allocation8 + $0x800] sm:$0xff] }
 0x101   :  { %2325 = vmatprep.subr.bf16.mxu1 %v2324_v10  ;;  %v795_v42 = vld [vmem:[#allocation8 + $0x7a8] sm:$0xff]  ;;  %v556_v10 = vld [vmem:[#allocation8 + $0x30] sm:$0xff]  ;;  %v810_v36 = vld [vmem:[#allocation8 + $0x820] sm:$0xff] }
 0x102   :  { %2393 = vmatprep.subr.bf16.mxu0 %v2392_v37  ;;  %v2396_v44 = vpack.c.bf16 %v795_v42, %v791_v41  ;;  %v799_v50 = vld [vmem:[#allocation8 + $0x7c8] sm:$0xff]  ;;  %v2534_v18 = vpack.c.bf16 %v556_v10, %v552_v9 }
 0x103   :  { %2395 = vmatpush1.bf16.msra.mxu0 %v2394_v40  ;;  %v803_v51 = vld [vmem:[#allocation8 + $0x7e8] sm:$0xff] }
 0x104   :  { %2327 = vmatpush1.bf16.msra.mxu1 %v2326_v15  ;;  %2397 = vmatprep.subr.bf16.mxu0 %v2396_v44  ;;  %v2400_v52 = vpack.c.bf16 %v803_v51, %v799_v50  ;;  %v807_v56 = vld [vmem:[#allocation8 + $0x808] sm:$0xff]  ;;  %v581_v44 = vld [vmem:[#allocation8 + $0xf8] sm:$0xff]  ;;  %v814_v50 = vld [vmem:[#allocation8 + $0x840] sm:$0xff] }
 0x105   :  { %2329 = vmatprep.subr.bf16.mxu1 %v2328_v16  ;;  %v811_v57 = vld [vmem:[#allocation8 + $0x828] sm:$0xff]  ;;  %v221_v16 = vrot.slane %v3480_v62, %v220_v4  ;;  %v818_v51 = vld [vmem:[#allocation8 + $0x860] sm:$0xff]  ;;  %v2544_v54 = vpack.c.bf16 %v581_v44, %v577_v43  ;;  %v609_v43 = vld [vmem:[#allocation8 + $0x1d8] sm:$0xff] }
 0x106   :  { %v2404_v58 = vpack.c.bf16 %v811_v57, %v807_v56  ;;  %v815_v40 = vld [vmem:[#allocation8 + $0x848] sm:$0xff]  ;;  %v580_v56 = vld [vmem:[#allocation8 + $0xf0] sm:$0xff]  ;;  %v2410_v4 = vpack.c.bf16 %v818_v51, %v814_v50  ;;  %v613_v44 = vld [vmem:[#allocation8 + $0x1f8] sm:$0xff] }
 0x107   :  { %2399 = vmatpush1.bf16.msra.mxu0 %v2398_v49  ;;  %v819_v42 = vld [vmem:[#allocation8 + $0x868] sm:$0xff]  ;;  %v2542_v49 = vpack.c.bf16 %v572_v39, %v568_v29  ;;  %v600_v39 = vld [vmem:[#allocation8 + $0x190] sm:$0xff]  ;;  %v2560_v51 = vpack.c.bf16 %v613_v44, %v609_v43 }
 0x108   :  { %2331 = vmatpush1.bf16.msra.mxu1 %v2330_v21  ;;  %2401 = vmatprep.subr.bf16.mxu0 %v2400_v52  ;;  %v2536_v21 = vpack.c.bf16 %v565_v14, %v561_v13  ;;  %v2408_v53 = vpack.c.bf16 %v819_v42, %v815_v40  ;;  %v823_v57 = vld [vmem:[#allocation8 + $0x888] sm:$0xff]  ;;  %v584_v13 = vld [vmem:[#allocation8 + $0x110] sm:$0xff] }
 0x109   :  { %2333 = vmatprep.subr.bf16.mxu1 %v2332_v22  ;;  %v560_v22 = vld [vmem:[#allocation8 + $0x50] sm:$0xff]  ;;  %v851_v42 = vld [vmem:[#allocation8 + $0x968] sm:$0xff] }
 0x10a   :  { %v2538_v34 = vpack.c.bf16 %v564_v23, %v560_v22  ;;  %v588_v14 = vld [vmem:[#allocation8 + $0x130] sm:$0xff]  ;;  %v834_v22 = vld [vmem:[#allocation8 + $0x8e0] sm:$0xff] }
 0x10b   :  { %2403 = vmatpush1.bf16.msra.mxu0 %v2402_v55  ;;  %v576_v55 = vld [vmem:[#allocation8 + $0xd0] sm:$0xff] }
 0x10c   :  { %2335 = vmatpush1.bf16.msra.mxu1 %v2334_v26  ;;  %2405 = vmatprep.subr.bf16.mxu0 %v2404_v58  ;;  %v569_v26 = vld [vmem:[#allocation8 + $0x98] sm:$0xff]  ;;  %v827_v58 = vld [vmem:[#allocation8 + $0x8a8] sm:$0xff]  ;;  %v604_v40 = vld [vmem:[#allocation8 + $0x1b0] sm:$0xff] }
 0x10d   :  { %2337 = vmatprep.subr.bf16.mxu1 %v2336_v33  ;;  %v2412_v10 = vpack.c.bf16 %v827_v58, %v823_v57  ;;  %v617_v57 = vld [vmem:[#allocation8 + $0x218] sm:$0xff] }
 0x10e   :  { %v621_v58 = vld [vmem:[#allocation8 + $0x238] sm:$0xff] }
 0x110   :  { %2339 = vmatpush1.bf16.msra.mxu1 %v2338_v38  ;;  %v2540_v38 = vpack.c.bf16 %v573_v27, %v569_v26  ;;  %v592_v27 = vld [vmem:[#allocation8 + $0x150] sm:$0xff] }
 0x111   :  { %2533 = vmatprep.subr.bf16.mxu1 %v2532_v48  ;;  %v2406_v48 = vpack.c.bf16 %v810_v36, %v806_v35  ;;  %v838_v36 = vld [vmem:[#allocation8 + $0x900] sm:$0xff] }
 0x196   :  { %v308_v3 = vpop.f32.mrb[0].mxu1 }
 0x197   :  { %v309_v5 = vadd.f32 %v308_v3, %v201_v1  ;;  %v310_v6 = vpop.f32.mrb[1].mxu1  ;;  %v589_v1 = vld [vmem:[#allocation8 + $0x138] sm:$0xff] }
 0x198   :  { %v311_v8 = vadd.f32 %v310_v6, %v205_v2  ;;  %v822_v6 = vld [vmem:[#allocation8 + $0x880] sm:$0xff] }
 0x199   :  { %v534_v12 = vmul.f32 0.01, %v309_v5  ;;  %vm526_vm1 = vcmp.gt.f32.partialorder %v309_v5, 0.0 }
 0x19a   :  { %v535_v15 = vmul.f32 0.01, %v311_v8  ;;  %vm527_vm2 = vcmp.gt.f32.partialorder %v311_v8, 0.0 }
 0x19b   :  { %v3499_v24 = vpop.f32.mrb[0].mxu0  ;;  %v3501_v25 = vsel %vm526_vm1, %v309_v5, %v534_v12  ;;  %v2546_v5 = vpack.c.bf16 %v580_v56, %v576_v55  ;;  %v2548_v12 = vpack.c.bf16 %v589_v1, %v585_v59  ;;  %v855_v55 = vld [vmem:[#allocation8 + $0x988] sm:$0xff]  ;;  %vm2079_vm1 = vcmask 523264  }
 0x19c   :  { %v543_v19 = vsel %vm527_vm2, %v311_v8, %v535_v15  ;;  %v452_v28 = vpop.f32.mrb[1].mxu0  ;;  %v826_v8 = vld [vmem:[#allocation8 + $0x8a0] sm:$0xff]  ;;  %v831_v15 = vld [vmem:[#allocation8 + $0x8c8] sm:$0xff] }
 0x19d   :  { %1148 = vmatprep.mubr.f32.mxu1 %v543_v19  ;;  %v453_v31 = vadd.f32 %v452_v28, %v221_v16  ;;  %v835_v16 = vld [vmem:[#allocation8 + $0x8e8] sm:$0xff]  ;;  %v596_v28 = vld [vmem:[#allocation8 + $0x170] sm:$0xff] }
 0x19e   :  { %v379_v30 = vpop.f32.mrb[2].mxu1  ;;  %1149 = vmatmul.mubr.f32.vlgmr.msra.gmra.mrb[6].mxu1 %v3501_v25  ;;  %v2416_v23 = vpack.c.bf16 %v835_v16, %v831_v15  ;;  %v2554_v35 = vpack.c.bf16 %v596_v28, %v592_v27  ;;  %v859_v56 = vld [vmem:[#allocation8 + $0x9a8] sm:$0xff]  ;;  %v625_v15 = vld [vmem:[#allocation8 + $0x258] sm:$0xff] }
 0x19f   :  { %v380_v32 = vadd.f32 %v379_v30, %v209_v17  ;;  %2535 = vmatpush1.bf16.msra.mxu1 %v2534_v18  ;;  %v381_v33 = vpop.f32.mrb[3].mxu1  ;;  %1432 = vmatprep.mubr.f32.mxu1 %v543_v19  ;;  %v539_v46 = vmul.f32 0.01, %v453_v31  ;;  %vm531_vm5 = vcmp.gt.f32.partialorder %v453_v31, 0.0  ;;  %v593_v17 = vld [vmem:[#allocation8 + $0x158] sm:$0xff]  ;;  %v2414_v19 = vpack.c.bf16 %v826_v8, %v822_v6  ;;  %v839_v30 = vld [vmem:[#allocation8 + $0x908] sm:$0xff] }
 0x1a0   :  { %v382_v37 = vadd.f32 %v381_v33, %v213_v20  ;;  %2537 = vmatprep.subr.bf16.mxu1 %v2536_v21  ;;  %v597_v18 = vld [vmem:[#allocation8 + $0x178] sm:$0xff]  ;;  %v2550_v20 = vpack.c.bf16 %v588_v14, %v584_v13  ;;  %v830_v21 = vld [vmem:[#allocation8 + $0x8c0] sm:$0xff]  ;;  %v2428_v6 = vpack.c.bf16 %v859_v56, %v855_v55  ;;  %v2564_v8 = vpack.c.bf16 %v621_v58, %v617_v57  ;;  %v863_v13 = vld [vmem:[#allocation8 + $0x9c8] sm:$0xff] }
 0x1a1   :  { %vm528_vm3 = vcmp.gt.f32.partialorder %v380_v32, 0.0  ;;  %v536_v41 = vmul.f32 0.01, %v380_v32  ;;  %v3510_v2 = vsel %vm531_vm5, %v453_v31, %v539_v46  ;;  %v2552_v26 = vpack.c.bf16 %v597_v18, %v593_v17  ;;  %v843_v31 = vld [vmem:[#allocation8 + $0x928] sm:$0xff]  ;;  %v605_v33 = vld [vmem:[#allocation8 + $0x1b8] sm:$0xff] }
 0x1a2   :  { %v537_v45 = vmul.f32 0.01, %v382_v37  ;;  %vm529_vm4 = vcmp.gt.f32.partialorder %v382_v37, 0.0  ;;  %v2558_v46 = vpack.c.bf16 %v604_v40, %v600_v39  ;;  %v867_v14 = vld [vmem:[#allocation8 + $0x9e8] sm:$0xff]  ;;  %v629_v16 = vld [vmem:[#allocation8 + $0x278] sm:$0xff] }
 0x1a3   :  { %2539 = vmatpush1.bf16.msra.mxu1 %v2538_v34  ;;  %v3504_v47 = vsel %vm528_vm3, %v380_v32, %v536_v41  ;;  %v601_v32 = vld [vmem:[#allocation8 + $0x198] sm:$0xff]  ;;  %v2418_v34 = vpack.c.bf16 %v834_v22, %v830_v21  ;;  %v847_v41 = vld [vmem:[#allocation8 + $0x948] sm:$0xff]  ;;  %v2432_v21 = vpack.c.bf16 %v867_v14, %v863_v13  ;;  %v2568_v22 = vpack.c.bf16 %v629_v16, %v625_v15 }
 0x1a4   :  { %v3506_v52 = vsel %vm529_vm4, %v382_v37, %v537_v45  ;;  %2541 = vmatprep.subr.bf16.mxu1 %v2540_v38  ;;  %v842_v37 = vld [vmem:[#allocation8 + $0x920] sm:$0xff]  ;;  %v2420_v38 = vpack.c.bf16 %v843_v31, %v839_v30  ;;  %v2556_v29 = vpack.c.bf16 %v605_v33, %v601_v32  ;;  %v2424_v50 = vpack.c.bf16 %v851_v42, %v847_v41  ;;  %v871_v27 = vld [vmem:[#allocation8 + $0xa08] sm:$0xff]  ;;  %v633_v30 = vld [vmem:[#allocation8 + $0x298] sm:$0xff] }
 0x1a5   :  { %1219 = vmatprep.mubr.f32.mxu0 %v3506_v52  ;;  %v2422_v45 = vpack.c.bf16 %v842_v37, %v838_v36  ;;  %v875_v28 = vld [vmem:[#allocation8 + $0xa28] sm:$0xff]  ;;  %v637_v31 = vld [vmem:[#allocation8 + $0x2b8] sm:$0xff] }
 0x1a6   :  { %1220 = vmatmul.mubr.f32.vlgmr.msra.gmra.mrb[2].mxu0 %v3504_v47  ;;  %v3512_v3 = vpop.f32.mrb[4].mxu1  ;;  %v2436_v36 = vpack.c.bf16 %v875_v28, %v871_v27  ;;  %v2572_v37 = vpack.c.bf16 %v637_v31, %v633_v30  ;;  %v879_v39 = vld [vmem:[#allocation8 + $0xa48] sm:$0xff]  ;;  %v641_v41 = vld [vmem:[#allocation8 + $0x2d8] sm:$0xff] }
 0x1a7   :  { %2407 = vmatpush1.bf16.msra.mxu0 %v2406_v48  ;;  %2543 = vmatpush1.bf16.msra.mxu1 %v2542_v49  ;;  %v3514_v9 = vpop.f32.mrb[5].mxu1  ;;  %v846_v48 = vld [vmem:[#allocation8 + $0x940] sm:$0xff]  ;;  %v883_v40 = vld [vmem:[#allocation8 + $0xa68] sm:$0xff]  ;;  %v645_v42 = vld [vmem:[#allocation8 + $0x2f8] sm:$0xff] }
 0x1a8   :  { %2409 = vmatprep.subr.bf16.mxu0 %v2408_v53  ;;  %2545 = vmatprep.subr.bf16.mxu1 %v2544_v54  ;;  %v850_v49 = vld [vmem:[#allocation8 + $0x960] sm:$0xff]  ;;  %v608_v53 = vld [vmem:[#allocation8 + $0x1d0] sm:$0xff]  ;;  %v649_v55 = vld [vmem:[#allocation8 + $0x318] sm:$0xff] }
 0x1a9   :  { %1290 = vmatprep.mubr.f32.mxu0 %v3510_v2  ;;  %v612_v54 = vld [vmem:[#allocation8 + $0x1f0] sm:$0xff]  ;;  %v2426_v59 = vpack.c.bf16 %v850_v49, %v846_v48  ;;  %v2440_v48 = vpack.c.bf16 %v883_v40, %v879_v39  ;;  %v2576_v49 = vpack.c.bf16 %v645_v42, %v641_v41  ;;  %v653_v56 = vld [vmem:[#allocation8 + $0x338] sm:$0xff] }
 0x1aa   :  { %v2562_v1 = vpack.c.bf16 %v612_v54, %v608_v53  ;;  %v887_v53 = vld [vmem:[#allocation8 + $0xa88] sm:$0xff]  ;;  %v657_v13 = vld [vmem:[#allocation8 + $0x358] sm:$0xff] }
 0x1ab   :  { %2411 = vmatpush1.bf16.msra.mxu0 %v2410_v4  ;;  %2547 = vmatpush1.bf16.msra.mxu1 %v2546_v5  ;;  %v854_v4 = vld [vmem:[#allocation8 + $0x980] sm:$0xff]  ;;  %v891_v54 = vld [vmem:[#allocation8 + $0xaa8] sm:$0xff]  ;;  %v661_v14 = vld [vmem:[#allocation8 + $0x378] sm:$0xff] }
 0x1ac   :  { %2413 = vmatprep.subr.bf16.mxu0 %v2412_v10  ;;  %2549 = vmatprep.subr.bf16.mxu1 %v2548_v12  ;;  %v858_v5 = vld [vmem:[#allocation8 + $0x9a0] sm:$0xff]  ;;  %v616_v10 = vld [vmem:[#allocation8 + $0x210] sm:$0xff]  ;;  %v665_v27 = vld [vmem:[#allocation8 + $0x398] sm:$0xff] }
 0x1ad   :  { %v620_v12 = vld [vmem:[#allocation8 + $0x230] sm:$0xff]  ;;  %v2430_v17 = vpack.c.bf16 %v858_v5, %v854_v4  ;;  %v2444_v4 = vpack.c.bf16 %v891_v54, %v887_v53  ;;  %v2580_v5 = vpack.c.bf16 %v653_v56, %v649_v55  ;;  %v669_v28 = vld [vmem:[#allocation8 + $0x3b8] sm:$0xff]  ;;  %v923_v53 = vld [vmem:[#allocation8 + $0xba8] sm:$0xff]  ;;  %v228_v56 = vsub.s32 7, %v3475_v60 }
 0x1ae   :  { %v2566_v18 = vpack.c.bf16 %v620_v12, %v616_v10  ;;  %v895_v10 = vld [vmem:[#allocation8 + $0xac8] sm:$0xff]  ;;  %v673_v39 = vld [vmem:[#allocation8 + $0x3d8] sm:$0xff] }
 0x1af   :  { %2415 = vmatpush1.bf16.msra.mxu0 %v2414_v19  ;;  %2551 = vmatpush1.bf16.msra.mxu1 %v2550_v20  ;;  %v862_v19 = vld [vmem:[#allocation8 + $0x9c0] sm:$0xff]  ;;  %v899_v12 = vld [vmem:[#allocation8 + $0xae8] sm:$0xff]  ;;  %v677_v40 = vld [vmem:[#allocation8 + $0x3f8] sm:$0xff] }
 0x1b0   :  { %2417 = vmatprep.subr.bf16.mxu0 %v2416_v23  ;;  %2553 = vmatprep.subr.bf16.mxu1 %v2552_v26  ;;  %v866_v20 = vld [vmem:[#allocation8 + $0x9e0] sm:$0xff]  ;;  %v624_v23 = vld [vmem:[#allocation8 + $0x250] sm:$0xff]  ;;  %v681_v54 = vld [vmem:[#allocation8 + $0x418] sm:$0xff] }
 0x1b1   :  { %v628_v26 = vld [vmem:[#allocation8 + $0x270] sm:$0xff]  ;;  %v2434_v32 = vpack.c.bf16 %v866_v20, %v862_v19  ;;  %v2448_v19 = vpack.c.bf16 %v899_v12, %v895_v10  ;;  %v2584_v20 = vpack.c.bf16 %v661_v14, %v657_v13  ;;  %v685_v55 = vld [vmem:[#allocation8 + $0x438] sm:$0xff]  ;;  %v927_v12 = vld [vmem:[#allocation8 + $0xbc8] sm:$0xff] }
 0x1b2   :  { %v2570_v33 = vpack.c.bf16 %v628_v26, %v624_v23  ;;  %v903_v23 = vld [vmem:[#allocation8 + $0xb08] sm:$0xff]  ;;  %v684_v10 = vld [vmem:[#allocation8 + $0x430] sm:$0xff]  ;;  %v689_v14 = vld [vmem:[#allocation8 + $0x458] sm:$0xff] }
 0x1b3   :  { %2419 = vmatpush1.bf16.msra.mxu0 %v2418_v34  ;;  %2555 = vmatpush1.bf16.msra.mxu1 %v2554_v35  ;;  %v870_v34 = vld [vmem:[#allocation8 + $0xa00] sm:$0xff]  ;;  %v907_v26 = vld [vmem:[#allocation8 + $0xb28] sm:$0xff] }
 0x1b4   :  { %2421 = vmatprep.subr.bf16.mxu0 %v2420_v38  ;;  %2557 = vmatprep.subr.bf16.mxu1 %v2556_v29  ;;  %v874_v35 = vld [vmem:[#allocation8 + $0xa20] sm:$0xff]  ;;  %v632_v38 = vld [vmem:[#allocation8 + $0x290] sm:$0xff]  ;;  %v931_v13 = vld [vmem:[#allocation8 + $0xbe8] sm:$0xff] }
 0x1b5   :  { %v636_v29 = vld [vmem:[#allocation8 + $0x2b0] sm:$0xff]  ;;  %v2438_v43 = vpack.c.bf16 %v874_v35, %v870_v34  ;;  %v2452_v34 = vpack.c.bf16 %v907_v26, %v903_v23  ;;  %v2588_v35 = vpack.c.bf16 %v669_v28, %v665_v27  ;;  %v935_v27 = vld [vmem:[#allocation8 + $0xc08] sm:$0xff] }
 0x1b6   :  { %v2574_v44 = vpack.c.bf16 %v636_v29, %v632_v38  ;;  %v911_v38 = vld [vmem:[#allocation8 + $0xb48] sm:$0xff]  ;;  %v688_v23 = vld [vmem:[#allocation8 + $0x450] sm:$0xff] }
 0x1b7   :  { %2423 = vmatpush1.bf16.msra.mxu0 %v2422_v45  ;;  %2559 = vmatpush1.bf16.msra.mxu1 %v2558_v46  ;;  %v878_v45 = vld [vmem:[#allocation8 + $0xa40] sm:$0xff]  ;;  %v915_v29 = vld [vmem:[#allocation8 + $0xb68] sm:$0xff]  ;;  %v692_v26 = vld [vmem:[#allocation8 + $0x470] sm:$0xff] }
 0x1b8   :  { %2425 = vmatprep.subr.bf16.mxu0 %v2424_v50  ;;  %2561 = vmatprep.subr.bf16.mxu1 %v2560_v51  ;;  %v882_v46 = vld [vmem:[#allocation8 + $0xa60] sm:$0xff]  ;;  %v640_v50 = vld [vmem:[#allocation8 + $0x2d0] sm:$0xff] }
 0x1b9   :  { %v644_v51 = vld [vmem:[#allocation8 + $0x2f0] sm:$0xff]  ;;  %v2442_v57 = vpack.c.bf16 %v882_v46, %v878_v45  ;;  %v216_v45 = vsub.s32 4, %v3475_v60  ;;  %v2456_v46 = vpack.c.bf16 %v915_v29, %v911_v38 }
 0x1ba   :  { %v2578_v58 = vpack.c.bf16 %v644_v51, %v640_v50  ;;  %v676_v50 = vld [vmem:[#allocation8 + $0x3f0] sm:$0xff]  ;;  %v919_v51 = vld [vmem:[#allocation8 + $0xb88] sm:$0xff] }
 0x1bb   :  { %2427 = vmatpush1.bf16.msra.mxu0 %v2426_v59  ;;  %2563 = vmatpush1.bf16.msra.mxu1 %v2562_v1  ;;  %v886_v59 = vld [vmem:[#allocation8 + $0xa80] sm:$0xff]  ;;  %v696_v29 = vld [vmem:[#allocation8 + $0x490] sm:$0xff] }
 0x1bc   :  { %2429 = vmatprep.subr.bf16.mxu0 %v2428_v6  ;;  %2565 = vmatprep.subr.bf16.mxu1 %v2564_v8  ;;  %v890_v1 = vld [vmem:[#allocation8 + $0xaa0] sm:$0xff]  ;;  %v648_v6 = vld [vmem:[#allocation8 + $0x310] sm:$0xff] }
 0x1bd   :  { %v652_v8 = vld [vmem:[#allocation8 + $0x330] sm:$0xff]  ;;  %v2446_v15 = vpack.c.bf16 %v890_v1, %v886_v59  ;;  %v217_v59 = vrot.slane %v3480_v62, %v216_v45  ;;  %v918_v1 = vld [vmem:[#allocation8 + $0xb80] sm:$0xff] }
 0x1be   :  { %v2582_v16 = vpack.c.bf16 %v652_v8, %v648_v6  ;;  %v922_v6 = vld [vmem:[#allocation8 + $0xba0] sm:$0xff]  ;;  %v680_v8 = vld [vmem:[#allocation8 + $0x410] sm:$0xff] }
 0x1bf   :  { %2431 = vmatpush1.bf16.msra.mxu0 %v2430_v17  ;;  %2567 = vmatpush1.bf16.msra.mxu1 %v2566_v18  ;;  %v894_v17 = vld [vmem:[#allocation8 + $0xac0] sm:$0xff] }
 0x1c0   :  { %2433 = vmatprep.subr.bf16.mxu0 %v2432_v21  ;;  %2569 = vmatprep.subr.bf16.mxu1 %v2568_v22  ;;  %v898_v18 = vld [vmem:[#allocation8 + $0xae0] sm:$0xff]  ;;  %v656_v21 = vld [vmem:[#allocation8 + $0x350] sm:$0xff] }
 0x1c1   :  { %v660_v22 = vld [vmem:[#allocation8 + $0x370] sm:$0xff]  ;;  %v2450_v30 = vpack.c.bf16 %v898_v18, %v894_v17  ;;  %v451_v17 = vadd.f32 %v3499_v24, %v217_v59  ;;  %v2462_v18 = vpack.c.bf16 %v922_v6, %v918_v1  ;;  %v950_v1 = vld [vmem:[#allocation8 + $0xc80] sm:$0xff] }
 0x1c2   :  { %v2586_v31 = vpack.c.bf16 %v660_v22, %v656_v21  ;;  %v930_v21 = vld [vmem:[#allocation8 + $0xbe0] sm:$0xff]  ;;  %v2464_v22 = vpack.c.bf16 %v931_v13, %v927_v12  ;;  %v959_v12 = vld [vmem:[#allocation8 + $0xcc8] sm:$0xff] }
 0x1c3   :  { %2435 = vmatpush1.bf16.msra.mxu0 %v2434_v32  ;;  %2571 = vmatpush1.bf16.msra.mxu1 %v2570_v33  ;;  %v902_v32 = vld [vmem:[#allocation8 + $0xb00] sm:$0xff]  ;;  %vm530_vm6 = vcmp.gt.f32.partialorder %v451_v17, 0.0  ;;  %v963_v13 = vld [vmem:[#allocation8 + $0xce8] sm:$0xff] }
 0x1c4   :  { %2437 = vmatprep.subr.bf16.mxu0 %v2436_v36  ;;  %2573 = vmatprep.subr.bf16.mxu1 %v2572_v37  ;;  %v906_v33 = vld [vmem:[#allocation8 + $0xb20] sm:$0xff]  ;;  %v664_v36 = vld [vmem:[#allocation8 + $0x390] sm:$0xff] }
 0x1c5   :  { %v668_v37 = vld [vmem:[#allocation8 + $0x3b0] sm:$0xff]  ;;  %v2454_v41 = vpack.c.bf16 %v906_v33, %v902_v32  ;;  %v701_v32 = vld [vmem:[#allocation8 + $0x4b8] sm:$0xff]  ;;  %v538_v33 = vmul.f32 0.01, %v451_v17 }
 0x1c6   :  { %v2590_v42 = vpack.c.bf16 %v668_v37, %v664_v36  ;;  %v938_v36 = vld [vmem:[#allocation8 + $0xc20] sm:$0xff] }
 0x1c7   :  { %2439 = vmatpush1.bf16.msra.mxu0 %v2438_v43  ;;  %2575 = vmatpush1.bf16.msra.mxu1 %v2574_v44  ;;  %v910_v43 = vld [vmem:[#allocation8 + $0xb40] sm:$0xff] }
 0x1c8   :  { %2441 = vmatprep.subr.bf16.mxu0 %v2440_v48  ;;  %2577 = vmatprep.subr.bf16.mxu1 %v2576_v49  ;;  %v914_v44 = vld [vmem:[#allocation8 + $0xb60] sm:$0xff]  ;;  %v2592_v48 = vpack.c.bf16 %v677_v40, %v673_v39  ;;  %v672_v49 = vld [vmem:[#allocation8 + $0x3d0] sm:$0xff]  ;;  %v943_v40 = vld [vmem:[#allocation8 + $0xc48] sm:$0xff] }
 0x1c9   :  { %v700_v39 = vld [vmem:[#allocation8 + $0x4b0] sm:$0xff] }
 0x1ca   :  { %v2606_v45 = vpack.c.bf16 %v700_v39, %v696_v29  ;;  %v737_v29 = vld [vmem:[#allocation8 + $0x5d8] sm:$0xff] }
 0x1cb   :  { %2443 = vmatpush1.bf16.msra.mxu0 %v2442_v57  ;;  %2579 = vmatpush1.bf16.msra.mxu1 %v2578_v58  ;;  %v2458_v57 = vpack.c.bf16 %v914_v44, %v910_v43  ;;  %v2594_v58 = vpack.c.bf16 %v676_v50, %v672_v49  ;;  %v3525_v43 = vsel %vm530_vm6, %v451_v17, %v538_v33  ;;  %v704_v50 = vld [vmem:[#allocation8 + $0x4d0] sm:$0xff]  ;;  %v970_v33 = vld [vmem:[#allocation8 + $0xd20] sm:$0xff]  ;;  %v741_v39 = vld [vmem:[#allocation8 + $0x5f8] sm:$0xff] }
 0x1cc   :  { %2445 = vmatprep.subr.bf16.mxu0 %v2444_v4  ;;  %2581 = vmatprep.subr.bf16.mxu1 %v2580_v5  ;;  %v2460_v4 = vpack.c.bf16 %v923_v53, %v919_v51  ;;  %v2596_v5 = vpack.c.bf16 %v685_v55, %v681_v54  ;;  %v708_v51 = vld [vmem:[#allocation8 + $0x4f0] sm:$0xff]  ;;  %v951_v53 = vld [vmem:[#allocation8 + $0xc88] sm:$0xff]  ;;  %v713_v55 = vld [vmem:[#allocation8 + $0x518] sm:$0xff] }
 0x1cd   :  { %v955_v54 = vld [vmem:[#allocation8 + $0xca8] sm:$0xff]  ;;  %v2610_v59 = vpack.c.bf16 %v708_v51, %v704_v50  ;;  %v749_v50 = vld [vmem:[#allocation8 + $0x638] sm:$0xff] }
 0x1cf   :  { %2447 = vmatpush1.bf16.msra.mxu0 %v2446_v15  ;;  %2583 = vmatpush1.bf16.msra.mxu1 %v2582_v16  ;;  %v693_v15 = vld [vmem:[#allocation8 + $0x478] sm:$0xff]  ;;  %v229_v16 = vrot.slane %v3480_v62, %v228_v56 }
 0x1d0   :  { %2449 = vmatprep.subr.bf16.mxu0 %v2448_v19  ;;  %2585 = vmatprep.subr.bf16.mxu1 %v2584_v20  ;;  %v2598_v19 = vpack.c.bf16 %v684_v10, %v680_v8  ;;  %v926_v20 = vld [vmem:[#allocation8 + $0xbc0] sm:$0xff]  ;;  %v2600_v28 = vpack.c.bf16 %v693_v15, %v689_v14  ;;  %v717_v56 = vld [vmem:[#allocation8 + $0x538] sm:$0xff]  ;;  %v712_v8 = vld [vmem:[#allocation8 + $0x510] sm:$0xff] }
 0x1d1   :  { %v524_v62 = vadd.f32 %v3514_v9, %v229_v16  ;;  %v2466_v24 = vpack.c.bf16 %v930_v21, %v926_v20  ;;  %v709_v9 = vld [vmem:[#allocation8 + $0x4f8] sm:$0xff]  ;;  %v2612_v6 = vpack.c.bf16 %v717_v56, %v713_v55  ;;  %v716_v10 = vld [vmem:[#allocation8 + $0x530] sm:$0xff]  ;;  %v2480_v20 = vpack.c.bf16 %v963_v13, %v959_v12  ;;  %v986_v55 = vld [vmem:[#allocation8 + $0xda0] sm:$0xff] }
 0x1d2   :  { %v721_v14 = vld [vmem:[#allocation8 + $0x558] sm:$0xff]  ;;  %v2614_v17 = vpack.c.bf16 %v716_v10, %v712_v8  ;;  %v990_v13 = vld [vmem:[#allocation8 + $0xdc0] sm:$0xff] }
 0x1d3   :  { %2451 = vmatpush1.bf16.msra.mxu0 %v2450_v30  ;;  %2587 = vmatpush1.bf16.msra.mxu1 %v2586_v31  ;;  %v939_v30 = vld [vmem:[#allocation8 + $0xc28] sm:$0xff]  ;;  %v697_v31 = vld [vmem:[#allocation8 + $0x498] sm:$0xff]  ;;  %vm533_vm7 = vcmp.gt.f32.partialorder %v524_v62, 0.0 }
 0x1d4   :  { %2453 = vmatprep.subr.bf16.mxu0 %v2452_v34  ;;  %2589 = vmatprep.subr.bf16.mxu1 %v2588_v35  ;;  %v2602_v34 = vpack.c.bf16 %v692_v26, %v688_v23  ;;  %v934_v35 = vld [vmem:[#allocation8 + $0xc00] sm:$0xff]  ;;  %v2468_v37 = vpack.c.bf16 %v939_v30, %v935_v27  ;;  %v2604_v38 = vpack.c.bf16 %v701_v32, %v697_v31  ;;  %v725_v15 = vld [vmem:[#allocation8 + $0x578] sm:$0xff]  ;;  %v724_v23 = vld [vmem:[#allocation8 + $0x570] sm:$0xff] }
 0x1d5   :  { %v2470_v44 = vpack.c.bf16 %v938_v36, %v934_v35  ;;  %v2616_v21 = vpack.c.bf16 %v725_v15, %v721_v14  ;;  %v967_v26 = vld [vmem:[#allocation8 + $0xd08] sm:$0xff]  ;;  %v733_v30 = vld [vmem:[#allocation8 + $0x5b8] sm:$0xff]  ;;  %v728_v35 = vld [vmem:[#allocation8 + $0x590] sm:$0xff] }
 0x1d6   :  { %v971_v27 = vld [vmem:[#allocation8 + $0xd28] sm:$0xff]  ;;  %v732_v36 = vld [vmem:[#allocation8 + $0x5b0] sm:$0xff]  ;;  %v757_v8 = vld [vmem:[#allocation8 + $0x678] sm:$0xff] }
 0x1d7   :  { %2455 = vmatpush1.bf16.msra.mxu0 %v2454_v41  ;;  %2591 = vmatpush1.bf16.msra.mxu1 %v2590_v42  ;;  %v705_v41 = vld [vmem:[#allocation8 + $0x4d8] sm:$0xff]  ;;  %v541_v42 = vmul.f32 0.01, %v524_v62  ;;  %v994_v14 = vld [vmem:[#allocation8 + $0xde0] sm:$0xff] }
 0x1d8   :  { %2457 = vmatprep.subr.bf16.mxu0 %v2456_v46  ;;  %2593 = vmatprep.subr.bf16.mxu1 %v2592_v48  ;;  %v942_v46 = vld [vmem:[#allocation8 + $0xc40] sm:$0xff]  ;;  %v2608_v49 = vpack.c.bf16 %v709_v9, %v705_v41 }
 0x1d9   :  { %v946_v48 = vld [vmem:[#allocation8 + $0xc60] sm:$0xff] }
 0x1da   :  { %v974_v41 = vld [vmem:[#allocation8 + $0xd40] sm:$0xff] }
 0x1db   :  { %2459 = vmatpush1.bf16.msra.mxu0 %v2458_v57  ;;  %2595 = vmatpush1.bf16.msra.mxu1 %v2594_v58  ;;  %v3528_v57 = vsel %vm533_vm7, %v524_v62, %v541_v42  ;;  %v2474_v58 = vpack.c.bf16 %v946_v48, %v942_v46  ;;  %v966_v62 = vld [vmem:[#allocation8 + $0xd00] sm:$0xff]  ;;  %v740_v46 = vld [vmem:[#allocation8 + $0x5f0] sm:$0xff]  ;;  %v983_v48 = vld [vmem:[#allocation8 + $0xd88] sm:$0xff] }
 0x1dc   :  { %2461 = vmatprep.subr.bf16.mxu0 %v2460_v4  ;;  %2597 = vmatprep.subr.bf16.mxu1 %v2596_v5  ;;  %v954_v4 = vld [vmem:[#allocation8 + $0xca0] sm:$0xff]  ;;  %v2476_v5 = vpack.c.bf16 %v955_v54, %v951_v53 }
 0x1dd   :  { %v2478_v16 = vpack.c.bf16 %v954_v4, %v950_v1  ;;  %v978_v9 = vld [vmem:[#allocation8 + $0xd60] sm:$0xff]  ;;  %v748_v1 = vld [vmem:[#allocation8 + $0x630] sm:$0xff]  ;;  %v991_v4 = vld [vmem:[#allocation8 + $0xdc8] sm:$0xff] }
 0x1de   :  { %1433 = vmatmul.mubr.f32.vlgmr.msra.gmra.mrb[8].mxu1 %v3501_v25  ;;  %v947_v25 = vld [vmem:[#allocation8 + $0xc68] sm:$0xff]  ;;  %v2490_v51 = vpack.c.bf16 %v978_v9, %v974_v41  ;;  %v982_v54 = vld [vmem:[#allocation8 + $0xd80] sm:$0xff]  ;;  %v772_v41 = vld [vmem:[#allocation8 + $0x6f0] sm:$0xff] }
 0x1df   :  { %2463 = vmatpush1.bf16.msra.mxu0 %v2462_v18  ;;  %2599 = vmatpush1.bf16.msra.mxu1 %v2598_v19  ;;  %v958_v18 = vld [vmem:[#allocation8 + $0xcc0] sm:$0xff]  ;;  %v2494_v10 = vpack.c.bf16 %v986_v55, %v982_v54  ;;  %v1015_v9 = vld [vmem:[#allocation8 + $0xe88] sm:$0xff]  ;;  %v780_v54 = vld [vmem:[#allocation8 + $0x730] sm:$0xff] }
 0x1e0   :  { %1503 = vmatprep.mubr.f32.mxu1 %v3506_v52  ;;  %2465 = vmatprep.subr.bf16.mxu0 %v2464_v22  ;;  %v2472_v52 = vpack.c.bf16 %v947_v25, %v943_v40  ;;  %v962_v19 = vld [vmem:[#allocation8 + $0xce0] sm:$0xff]  ;;  %v720_v22 = vld [vmem:[#allocation8 + $0x550] sm:$0xff]  ;;  %v2486_v40 = vpack.c.bf16 %v970_v33, %v966_v62  ;;  %v2622_v25 = vpack.c.bf16 %v732_v36, %v728_v35  ;;  %v1007_v33 = vld [vmem:[#allocation8 + $0xe48] sm:$0xff] }
 0x1e1   :  { %2601 = vmatprep.subr.bf16.mxu1 %v2600_v28  ;;  %v729_v28 = vld [vmem:[#allocation8 + $0x598] sm:$0xff]  ;;  %v2482_v31 = vpack.c.bf16 %v962_v19, %v958_v18  ;;  %v2618_v32 = vpack.c.bf16 %v724_v23, %v720_v22  ;;  %v756_v18 = vld [vmem:[#allocation8 + $0x670] sm:$0xff]  ;;  %v999_v19 = vld [vmem:[#allocation8 + $0xe08] sm:$0xff]  ;;  %v2498_v23 = vpack.c.bf16 %v994_v14, %v990_v13 }
 0x1e2   :  { %v765_v22 = vld [vmem:[#allocation8 + $0x6b8] sm:$0xff]  ;;  %v764_v62 = vld [vmem:[#allocation8 + $0x6b0] sm:$0xff]  ;;  %v1023_v55 = vld [vmem:[#allocation8 + $0xec8] sm:$0xff] }
 0x1e3   :  { %2467 = vmatpush1.bf16.msra.mxu0 %v2466_v24  ;;  %2603 = vmatpush1.bf16.msra.mxu1 %v2602_v34  ;;  %v2484_v24 = vpack.c.bf16 %v971_v27, %v967_v26  ;;  %v2620_v34 = vpack.c.bf16 %v733_v30, %v729_v28  ;;  %v998_v27 = vld [vmem:[#allocation8 + $0xe00] sm:$0xff]  ;;  %v773_v35 = vld [vmem:[#allocation8 + $0x6f8] sm:$0xff]  ;;  %v788_v13 = vld [vmem:[#allocation8 + $0x770] sm:$0xff] }
 0x1e4   :  { %2469 = vmatprep.subr.bf16.mxu0 %v2468_v37  ;;  %2605 = vmatprep.subr.bf16.mxu1 %v2604_v38  ;;  %v975_v37 = vld [vmem:[#allocation8 + $0xd48] sm:$0xff]  ;;  %v1002_v28 = vld [vmem:[#allocation8 + $0xe20] sm:$0xff] }
 0x1e5   :  { %v979_v38 = vld [vmem:[#allocation8 + $0xd68] sm:$0xff]  ;;  %v2502_v36 = vpack.c.bf16 %v1002_v28, %v998_v27  ;;  %v796_v27 = vld [vmem:[#allocation8 + $0x7b0] sm:$0xff] }
 0x1e6   :  { %1291 = vmatmul.mubr.f32.vlgmr.msra.gmra.mrb[2].mxu0 %v3525_v43  ;;  %v2488_v42 = vpack.c.bf16 %v979_v38, %v975_v37  ;;  %v1006_v38 = vld [vmem:[#allocation8 + $0xe40] sm:$0xff]  ;;  %v1031_v14 = vld [vmem:[#allocation8 + $0xf08] sm:$0xff] }
 0x1e7   :  { %2471 = vmatpush1.bf16.msra.mxu0 %v2470_v44  ;;  %2607 = vmatpush1.bf16.msra.mxu1 %v2606_v45  ;;  %v2624_v44 = vpack.c.bf16 %v741_v39, %v737_v29  ;;  %v736_v45 = vld [vmem:[#allocation8 + $0x5d0] sm:$0xff]  ;;  %v1010_v29 = vld [vmem:[#allocation8 + $0xe60] sm:$0xff]  ;;  %v1039_v28 = vld [vmem:[#allocation8 + $0xf48] sm:$0xff] }
 0x1e8   :  { %2473 = vmatprep.subr.bf16.mxu0 %v2472_v52  ;;  %2609 = vmatprep.subr.bf16.mxu1 %v2608_v49  ;;  %v987_v52 = vld [vmem:[#allocation8 + $0xda8] sm:$0xff]  ;;  %v745_v49 = vld [vmem:[#allocation8 + $0x618] sm:$0xff]  ;;  %v2626_v53 = vpack.c.bf16 %v740_v46, %v736_v45  ;;  %v2506_v46 = vpack.c.bf16 %v1010_v29, %v1006_v38  ;;  %v800_v38 = vld [vmem:[#allocation8 + $0x7d0] sm:$0xff] }
 0x1e9   :  { %1361 = vmatprep.mubr.f32.mxu0 %v3528_v57  ;;  %v2492_v56 = vpack.c.bf16 %v987_v52, %v983_v48  ;;  %v781_v45 = vld [vmem:[#allocation8 + $0x738] sm:$0xff]  ;;  %v1014_v52 = vld [vmem:[#allocation8 + $0xe80] sm:$0xff]  ;;  %v804_v29 = vld [vmem:[#allocation8 + $0x7f0] sm:$0xff] }
 0x1eb   :  { %2475 = vmatpush1.bf16.msra.mxu0 %v2474_v58  ;;  %2611 = vmatpush1.bf16.msra.mxu1 %v2610_v59  ;;  %v2628_v58 = vpack.c.bf16 %v749_v50, %v745_v49  ;;  %v744_v59 = vld [vmem:[#allocation8 + $0x610] sm:$0xff]  ;;  %v1018_v49 = vld [vmem:[#allocation8 + $0xea0] sm:$0xff] }
 0x1ec   :  { %2477 = vmatprep.subr.bf16.mxu0 %v2476_v5  ;;  %2613 = vmatprep.subr.bf16.mxu1 %v2612_v6  ;;  %v995_v5 = vld [vmem:[#allocation8 + $0xde8] sm:$0xff]  ;;  %v753_v6 = vld [vmem:[#allocation8 + $0x658] sm:$0xff]  ;;  %v2630_v12 = vpack.c.bf16 %v748_v1, %v744_v59  ;;  %v2510_v1 = vpack.c.bf16 %v1018_v49, %v1014_v52  ;;  %v1050_v49 = vld [vmem:[#allocation8 + $0xfa0] sm:$0xff] }
 0x1ed   :  { %v2496_v15 = vpack.c.bf16 %v995_v5, %v991_v4  ;;  %v789_v59 = vld [vmem:[#allocation8 + $0x778] sm:$0xff]  ;;  %v1022_v5 = vld [vmem:[#allocation8 + $0xec0] sm:$0xff] }
 0x1ef   :  { %2479 = vmatpush1.bf16.msra.mxu0 %v2478_v16  ;;  %2615 = vmatpush1.bf16.msra.mxu1 %v2614_v17  ;;  %v2632_v16 = vpack.c.bf16 %v757_v8, %v753_v6  ;;  %v752_v17 = vld [vmem:[#allocation8 + $0x650] sm:$0xff]  ;;  %v1026_v6 = vld [vmem:[#allocation8 + $0xee0] sm:$0xff] }
 0x1f0   :  { %2481 = vmatprep.subr.bf16.mxu0 %v2480_v20  ;;  %2617 = vmatprep.subr.bf16.mxu1 %v2616_v21  ;;  %v1003_v20 = vld [vmem:[#allocation8 + $0xe28] sm:$0xff]  ;;  %v761_v21 = vld [vmem:[#allocation8 + $0x698] sm:$0xff]  ;;  %v2634_v26 = vpack.c.bf16 %v756_v18, %v752_v17  ;;  %v2514_v18 = vpack.c.bf16 %v1026_v6, %v1022_v5  ;;  %v1058_v6 = vld [vmem:[#allocation8 + $0xfe0] sm:$0xff] }
 0x1f1   :  { %v2500_v30 = vpack.c.bf16 %v1003_v20, %v999_v19  ;;  %v797_v17 = vld [vmem:[#allocation8 + $0x7b8] sm:$0xff]  ;;  %v1030_v20 = vld [vmem:[#allocation8 + $0xf00] sm:$0xff] }
 0x1f3   :  { %2483 = vmatpush1.bf16.msra.mxu0 %v2482_v31  ;;  %2619 = vmatpush1.bf16.msra.mxu1 %v2618_v32  ;;  %v2636_v31 = vpack.c.bf16 %v765_v22, %v761_v21  ;;  %v760_v32 = vld [vmem:[#allocation8 + $0x690] sm:$0xff]  ;;  %v1034_v21 = vld [vmem:[#allocation8 + $0xf20] sm:$0xff] }
 0x1f4   :  { %2485 = vmatprep.subr.bf16.mxu0 %v2484_v24  ;;  %2621 = vmatprep.subr.bf16.mxu1 %v2620_v34  ;;  %v1011_v24 = vld [vmem:[#allocation8 + $0xe68] sm:$0xff]  ;;  %v769_v34 = vld [vmem:[#allocation8 + $0x6d8] sm:$0xff]  ;;  %v2638_v37 = vpack.c.bf16 %v764_v62, %v760_v32  ;;  %v2518_v62 = vpack.c.bf16 %v1034_v21, %v1030_v20  ;;  %v828_v20 = vld [vmem:[#allocation8 + $0x8b0] sm:$0xff] }
 0x1f5   :  { %v2504_v39 = vpack.c.bf16 %v1011_v24, %v1007_v33  ;;  %v805_v32 = vld [vmem:[#allocation8 + $0x7f8] sm:$0xff]  ;;  %v1038_v24 = vld [vmem:[#allocation8 + $0xf40] sm:$0xff] }
 0x1f7   :  { %2487 = vmatpush1.bf16.msra.mxu0 %v2486_v40  ;;  %2623 = vmatpush1.bf16.msra.mxu1 %v2622_v25  ;;  %v2640_v40 = vpack.c.bf16 %v773_v35, %v769_v34  ;;  %v768_v25 = vld [vmem:[#allocation8 + $0x6d0] sm:$0xff]  ;;  %v1042_v34 = vld [vmem:[#allocation8 + $0xf60] sm:$0xff]  ;;  %v224_v35 = vsub.s32 6, %v3475_v60  ;;  %v1971_v60 = vld [vmem:[%s3677_s7 + $0x98] sm:$0xff] }
 0x1f8   :  { %2489 = vmatprep.subr.bf16.mxu0 %v2488_v42  ;;  %2625 = vmatprep.subr.bf16.mxu1 %v2624_v44  ;;  %v1019_v42 = vld [vmem:[#allocation8 + $0xea8] sm:$0xff]  ;;  %v777_v44 = vld [vmem:[#allocation8 + $0x718] sm:$0xff]  ;;  %v2642_v48 = vpack.c.bf16 %v772_v41, %v768_v25 }
 0x1f9   :  { %v2508_v50 = vpack.c.bf16 %v1019_v42, %v1015_v9  ;;  %v809_v25 = vld [vmem:[#allocation8 + $0x818] sm:$0xff]  ;;  %v2522_v9 = vpack.c.bf16 %v1042_v34, %v1038_v24  ;;  %v2658_v42 = vpack.c.bf16 %v804_v29, %v800_v38  ;;  %v1673_v29 = vld [vmem:[#allocation11 + $0x48] sm:$0xff] }
 0x1fa   :  { %v813_v41 = vld [vmem:[#allocation8 + $0x838] sm:$0xff] }
 0x1fb   :  { %2491 = vmatpush1.bf16.msra.mxu0 %v2490_v51  ;;  %2627 = vmatpush1.bf16.msra.mxu1 %v2626_v53  ;;  %v2644_v51 = vpack.c.bf16 %v781_v45, %v777_v44  ;;  %v776_v53 = vld [vmem:[#allocation8 + $0x710] sm:$0xff]  ;;  %v3002_v44 = vld [vmem:[#allocation7] sm:$0xff]  ;;  %v2660_v52 = vpack.c.bf16 %v813_v41, %v809_v25 }
 0x1fc   :  { %2493 = vmatprep.subr.bf16.mxu0 %v2492_v56  ;;  %2629 = vmatprep.subr.bf16.mxu1 %v2628_v58  ;;  %v1027_v56 = vld [vmem:[#allocation8 + $0xee8] sm:$0xff]  ;;  %v785_v58 = vld [vmem:[#allocation8 + $0x758] sm:$0xff]  ;;  %v2646_v4 = vpack.c.bf16 %v780_v54, %v776_v53  ;;  %v225_v45 = vrot.slane %v3002_v44, %v224_v35  ;;  %v840_v25 = vld [vmem:[#allocation8 + $0x910] sm:$0xff] }
 0x1fd   :  { %v2512_v8 = vpack.c.bf16 %v1027_v56, %v1023_v55  ;;  %v1055_v53 = vld [vmem:[#allocation8 + $0xfc8] sm:$0xff]  ;;  %v817_v55 = vld [vmem:[#allocation8 + $0x858] sm:$0xff]  ;;  %v844_v41 = vld [vmem:[#allocation8 + $0x930] sm:$0xff] }
 0x1fe   :  { %v1059_v54 = vld [vmem:[#allocation8 + $0xfe8] sm:$0xff]  ;;  %v821_v56 = vld [vmem:[#allocation8 + $0x878] sm:$0xff] }
 0x1ff   :  { %2495 = vmatpush1.bf16.msra.mxu0 %v2494_v10  ;;  %2631 = vmatpush1.bf16.msra.mxu1 %v2630_v12  ;;  %v2648_v10 = vpack.c.bf16 %v789_v59, %v785_v58  ;;  %v784_v12 = vld [vmem:[#allocation8 + $0x750] sm:$0xff]  ;;  %v522_v58 = vadd.f32 %v3512_v3, %v225_v45  ;;  %v2528_v5 = vpack.c.bf16 %v1059_v54, %v1055_v53  ;;  %v841_v34 = vld [vmem:[#allocation8 + $0x918] sm:$0xff] }
 0x200   :  { %2497 = vmatprep.subr.bf16.mxu0 %v2496_v15  ;;  %2633 = vmatprep.subr.bf16.mxu1 %v2632_v16  ;;  %v1035_v15 = vld [vmem:[#allocation8 + $0xf28] sm:$0xff]  ;;  %v793_v16 = vld [vmem:[#allocation8 + $0x798] sm:$0xff]  ;;  %v2650_v19 = vpack.c.bf16 %v788_v13, %v784_v12  ;;  %v2664_v12 = vpack.c.bf16 %v821_v56, %v817_v55  ;;  %v848_v53 = vld [vmem:[#allocation8 + $0x950] sm:$0xff] }
 0x201   :  { %v2516_v22 = vpack.c.bf16 %v1035_v15, %v1031_v14  ;;  %v825_v13 = vld [vmem:[#allocation8 + $0x898] sm:$0xff]  ;;  %v1665_v15 = vld [vmem:[#allocation11 + $0x8] sm:$0xff]  ;;  %vm532_vm8 = vcmp.gt.f32.partialorder %v522_v58, 0.0 }
 0x202   :  { %v829_v14 = vld [vmem:[#allocation8 + $0x8b8] sm:$0xff]  ;;  %v852_v54 = vld [vmem:[#allocation8 + $0x970] sm:$0xff] }
 0x203   :  { %2499 = vmatpush1.bf16.msra.mxu0 %v2498_v23  ;;  %2635 = vmatpush1.bf16.msra.mxu1 %v2634_v26  ;;  %v2652_v23 = vpack.c.bf16 %v797_v17, %v793_v16  ;;  %v792_v26 = vld [vmem:[#allocation8 + $0x790] sm:$0xff]  ;;  %v1667_v16 = vld [vmem:[#allocation11 + $0x18] sm:$0xff]  ;;  %v540_v17 = vmul.f32 0.01, %v522_v58  ;;  %v2668_v21 = vpack.c.bf16 %v829_v14, %v825_v13 }
 0x204   :  { %2501 = vmatprep.subr.bf16.mxu0 %v2500_v30  ;;  %2637 = vmatprep.subr.bf16.mxu1 %v2636_v31  ;;  %v1043_v30 = vld [vmem:[#allocation8 + $0xf68] sm:$0xff]  ;;  %v801_v31 = vld [vmem:[#allocation8 + $0x7d8] sm:$0xff]  ;;  %v2654_v33 = vpack.c.bf16 %v796_v27, %v792_v26  ;;  %v860_v13 = vld [vmem:[#allocation8 + $0x9b0] sm:$0xff] }
 0x205   :  { %v1664_v26 = vld [vmem:[#allocation11] sm:$0xff]  ;;  %v1666_v27 = vld [vmem:[#allocation11 + $0x10] sm:$0xff] }
 0x206   :  { %v2790_v24 = vpack.c.bf16 %v1666_v27, %v1664_v26  ;;  %v845_v38 = vld [vmem:[#allocation8 + $0x938] sm:$0xff]  ;;  %v868_v26 = vld [vmem:[#allocation8 + $0x9f0] sm:$0xff] }
 0x207   :  { %2503 = vmatpush1.bf16.msra.mxu0 %v2502_v36  ;;  %2639 = vmatpush1.bf16.msra.mxu1 %v2638_v37  ;;  %v2520_v36 = vpack.c.bf16 %v1043_v30, %v1039_v28  ;;  %v2656_v37 = vpack.c.bf16 %v805_v32, %v801_v31  ;;  %v1669_v28 = vld [vmem:[#allocation11 + $0x28] sm:$0xff]  ;;  %v1671_v30 = vld [vmem:[#allocation11 + $0x38] sm:$0xff]  ;;  %v3535_v31 = vsel %vm532_vm8, %v522_v58, %v540_v17 }
 0x208   :  { %2505 = vmatprep.subr.bf16.mxu0 %v2504_v39  ;;  %2641 = vmatprep.subr.bf16.mxu1 %v2640_v40  ;;  %v1047_v39 = vld [vmem:[#allocation8 + $0xf88] sm:$0xff]  ;;  %v2792_v35 = vpack.c.bf16 %v1671_v30, %v1669_v28  ;;  %v849_v44 = vld [vmem:[#allocation8 + $0x958] sm:$0xff] }
 0x209   :  { %v1051_v40 = vld [vmem:[#allocation8 + $0xfa8] sm:$0xff]  ;;  %v857_v58 = vld [vmem:[#allocation8 + $0x998] sm:$0xff] }
 0x20a   :  { %v873_v28 = vld [vmem:[#allocation8 + $0xa18] sm:$0xff] }
 0x20b   :  { %2507 = vmatpush1.bf16.msra.mxu0 %v2506_v46  ;;  %2643 = vmatpush1.bf16.msra.mxu1 %v2642_v48  ;;  %v1046_v46 = vld [vmem:[#allocation8 + $0xf80] sm:$0xff]  ;;  %v2524_v48 = vpack.c.bf16 %v1051_v40, %v1047_v39 }
 0x20c   :  { %2509 = vmatprep.subr.bf16.mxu0 %v2508_v50  ;;  %2645 = vmatprep.subr.bf16.mxu1 %v2644_v51  ;;  %v808_v50 = vld [vmem:[#allocation8 + $0x810] sm:$0xff]  ;;  %v2526_v59 = vpack.c.bf16 %v1050_v49, %v1046_v46  ;;  %v1675_v39 = vld [vmem:[#allocation11 + $0x58] sm:$0xff]  ;;  %v1672_v46 = vld [vmem:[#allocation11 + $0x40] sm:$0xff] }
 0x20d   :  { %v812_v51 = vld [vmem:[#allocation8 + $0x830] sm:$0xff]  ;;  %v2796_v45 = vpack.c.bf16 %v1675_v39, %v1673_v29  ;;  %v881_v29 = vld [vmem:[#allocation8 + $0xa58] sm:$0xff] }
 0x20e   :  { %v1677_v49 = vld [vmem:[#allocation11 + $0x68] sm:$0xff] }
 0x20f   :  { %2511 = vmatpush1.bf16.msra.mxu0 %v2510_v1  ;;  %2647 = vmatpush1.bf16.msra.mxu1 %v2646_v4  ;;  %v2662_v1 = vpack.c.bf16 %v812_v51, %v808_v50  ;;  %v1054_v4 = vld [vmem:[#allocation8 + $0xfc0] sm:$0xff]  ;;  %v2678_v51 = vpack.c.bf16 %v844_v41, %v840_v25  ;;  %v1690_v25 = vld [vmem:[#allocation11 + $0xd0] sm:$0xff] }
 0x210   :  { %2513 = vmatprep.subr.bf16.mxu0 %v2512_v8  ;;  %2649 = vmatprep.subr.bf16.mxu1 %v2648_v10  ;;  %v816_v8 = vld [vmem:[#allocation8 + $0x850] sm:$0xff]  ;;  %v2530_v3 = vpack.c.bf16 %v1058_v6, %v1054_v4  ;;  %v1679_v50 = vld [vmem:[#allocation11 + $0x78] sm:$0xff] }
 0x211   :  { %v820_v10 = vld [vmem:[#allocation8 + $0x870] sm:$0xff]  ;;  %v885_v41 = vld [vmem:[#allocation8 + $0xa78] sm:$0xff] }
 0x212   :  { %v1678_v4 = vld [vmem:[#allocation11 + $0x70] sm:$0xff]  ;;  %v1681_v6 = vld [vmem:[#allocation11 + $0x88] sm:$0xff] }
 0x213   :  { %2515 = vmatpush1.bf16.msra.mxu0 %v2514_v18  ;;  %2651 = vmatpush1.bf16.msra.mxu1 %v2650_v19  ;;  %v2666_v18 = vpack.c.bf16 %v820_v10, %v816_v8  ;;  %v824_v19 = vld [vmem:[#allocation8 + $0x890] sm:$0xff]  ;;  %v1683_v8 = vld [vmem:[#allocation11 + $0x98] sm:$0xff]  ;;  %v2682_v10 = vpack.c.bf16 %v852_v54, %v848_v53 }
 0x214   :  { %2517 = vmatprep.subr.bf16.mxu0 %v2516_v22  ;;  %2653 = vmatprep.subr.bf16.mxu1 %v2652_v23  ;;  %v833_v22 = vld [vmem:[#allocation8 + $0x8d8] sm:$0xff]  ;;  %v2788_v23 = vpack.c.bf16 %v1667_v16, %v1665_v15  ;;  %v2670_v32 = vpack.c.bf16 %v828_v20, %v824_v19  ;;  %v2804_v17 = vpack.c.bf16 %v1683_v8, %v1681_v6  ;;  %v1685_v20 = vld [vmem:[#allocation11 + $0xa8] sm:$0xff] }
 0x215   :  { %v865_v16 = vld [vmem:[#allocation8 + $0x9d8] sm:$0xff] }
 0x216   :  { %v869_v19 = vld [vmem:[#allocation8 + $0x9f8] sm:$0xff] }
 0x217   :  { %2519 = vmatpush1.bf16.msra.mxu0 %v2518_v62  ;;  %2655 = vmatpush1.bf16.msra.mxu1 %v2654_v33  ;;  %v832_v62 = vld [vmem:[#allocation8 + $0x8d0] sm:$0xff]  ;;  %v893_v54 = vld [vmem:[#allocation8 + $0xab8] sm:$0xff] }
 0x218   :  { %2521 = vmatprep.subr.bf16.mxu0 %v2520_v36  ;;  %2657 = vmatprep.subr.bf16.mxu1 %v2656_v37  ;;  %v836_v33 = vld [vmem:[#allocation8 + $0x8f0] sm:$0xff]  ;;  %v1668_v36 = vld [vmem:[#allocation11 + $0x20] sm:$0xff]  ;;  %v897_v6 = vld [vmem:[#allocation8 + $0xad8] sm:$0xff] }
 0x219   :  { %v1670_v37 = vld [vmem:[#allocation11 + $0x30] sm:$0xff]  ;;  %v2674_v40 = vpack.c.bf16 %v836_v33, %v832_v62 }
 0x21a   :  { %v1686_v62 = vld [vmem:[#allocation11 + $0xb0] sm:$0xff] }
 0x21b   :  { %2523 = vmatpush1.bf16.msra.mxu0 %v2522_v9  ;;  %2659 = vmatpush1.bf16.msra.mxu1 %v2658_v42  ;;  %v2794_v9 = vpack.c.bf16 %v1670_v37, %v1668_v36  ;;  %v2676_v42 = vpack.c.bf16 %v845_v38, %v841_v34  ;;  %v877_v33 = vld [vmem:[#allocation8 + $0xa38] sm:$0xff]  ;;  %v876_v36 = vld [vmem:[#allocation8 + $0xa30] sm:$0xff] }
 0x21c   :  { %2525 = vmatprep.subr.bf16.mxu0 %v2524_v48  ;;  %2661 = vmatprep.subr.bf16.mxu1 %v2660_v52  ;;  %v1674_v48 = vld [vmem:[#allocation11 + $0x50] sm:$0xff]  ;;  %v2692_v38 = vpack.c.bf16 %v877_v33, %v873_v28 }
 0x21d   :  { %v853_v52 = vld [vmem:[#allocation8 + $0x978] sm:$0xff]  ;;  %v2798_v55 = vpack.c.bf16 %v1674_v48, %v1672_v46  ;;  %v884_v46 = vld [vmem:[#allocation8 + $0xa70] sm:$0xff] }
 0x21e   :  { %1504 = vmatmul.mubr.f32.vlgmr.msra.gmra.mrb[8].mxu1 %v3504_v47  ;;  %v837_v47 = vld [vmem:[#allocation8 + $0x8f8] sm:$0xff]  ;;  %v2680_v56 = vpack.c.bf16 %v853_v52, %v849_v44  ;;  %v2696_v52 = vpack.c.bf16 %v885_v41, %v881_v29 }
 0x21f   :  { %2527 = vmatpush1.bf16.msra.mxu0 %v2526_v59  ;;  %2663 = vmatpush1.bf16.msra.mxu1 %v2662_v1  ;;  %v2800_v59 = vpack.c.bf16 %v1679_v50, %v1677_v49  ;;  %v1676_v1 = vld [vmem:[#allocation11 + $0x60] sm:$0xff]  ;;  %v889_v49 = vld [vmem:[#allocation8 + $0xa98] sm:$0xff] }
 0x220   :  { %1574 = vmatprep.mubr.f32.mxu1 %v3510_v2  ;;  %2529 = vmatprep.subr.bf16.mxu0 %v2528_v5  ;;  %v2672_v2 = vpack.c.bf16 %v837_v47, %v833_v22  ;;  %v861_v5 = vld [vmem:[#allocation8 + $0x9b8] sm:$0xff]  ;;  %v2802_v14 = vpack.c.bf16 %v1678_v4, %v1676_v1  ;;  %v2688_v47 = vpack.c.bf16 %v869_v19, %v865_v16  ;;  %v892_v1 = vld [vmem:[#allocation8 + $0xab0] sm:$0xff] }
 0x221   :  { %2665 = vmatprep.subr.bf16.mxu1 %v2664_v12  ;;  %v856_v12 = vld [vmem:[#allocation8 + $0x990] sm:$0xff]  ;;  %v2684_v15 = vpack.c.bf16 %v861_v5, %v857_v58  ;;  %v2700_v5 = vpack.c.bf16 %v893_v54, %v889_v49 }
 0x222   :  { %v2686_v22 = vpack.c.bf16 %v860_v13, %v856_v12  ;;  %v1694_v53 = vld [vmem:[#allocation11 + $0xf0] sm:$0xff] }
 0x223   :  { %2531 = vmatpush1.bf16.msra.mxu0 %v2530_v3  ;;  %2667 = vmatpush1.bf16.msra.mxu1 %v2666_v18  ;;  %v1680_v3 = vld [vmem:[#allocation11 + $0x80] sm:$0xff]  ;;  %v1682_v18 = vld [vmem:[#allocation11 + $0x90] sm:$0xff] }
 0x224   :  { %2669 = vmatprep.subr.bf16.mxu1 %v2668_v21  ;;  %2789 = vmatprep.subr.bf16.mxu0 %v2788_v23  ;;  %v1687_v21 = vld [vmem:[#allocation11 + $0xb8] sm:$0xff]  ;;  %v864_v23 = vld [vmem:[#allocation8 + $0x9d0] sm:$0xff]  ;;  %v2806_v27 = vpack.c.bf16 %v1682_v18, %v1680_v3 }
 0x225   :  { %v2808_v30 = vpack.c.bf16 %v1687_v21, %v1685_v20  ;;  %v2690_v34 = vpack.c.bf16 %v868_v26, %v864_v23  ;;  %v1698_v12 = vld [vmem:[#allocation11 + $0x110] sm:$0xff] }
 0x226   :  { %1362 = vmatmul.mubr.f32.vlgmr.msra.gmra.mrb[2].mxu0 %v3535_v31  ;;  %v901_v13 = vld [vmem:[#allocation8 + $0xaf8] sm:$0xff]  ;;  %v900_v3 = vld [vmem:[#allocation8 + $0xaf0] sm:$0xff] }
 0x227   :  { %2671 = vmatpush1.bf16.msra.mxu1 %v2670_v32  ;;  %2791 = vmatpush1.bf16.msra.mxu0 %v2790_v24  ;;  %v1684_v32 = vld [vmem:[#allocation11 + $0xa0] sm:$0xff]  ;;  %v1689_v24 = vld [vmem:[#allocation11 + $0xc8] sm:$0xff]  ;;  %v2704_v19 = vpack.c.bf16 %v901_v13, %v897_v6  ;;  %v905_v20 = vld [vmem:[#allocation8 + $0xb18] sm:$0xff] }
 0x228   :  { %2673 = vmatprep.subr.bf16.mxu1 %v2672_v2  ;;  %2793 = vmatprep.subr.bf16.mxu0 %v2792_v35  ;;  %v1691_v2 = vld [vmem:[#allocation11 + $0xd8] sm:$0xff]  ;;  %v872_v35 = vld [vmem:[#allocation8 + $0xa10] sm:$0xff]  ;;  %v2810_v37 = vpack.c.bf16 %v1686_v62, %v1684_v32 }
 0x229   :  { %v2812_v39 = vpack.c.bf16 %v1691_v2, %v1689_v24  ;;  %v2694_v44 = vpack.c.bf16 %v876_v36, %v872_v35  ;;  %v1702_v23 = vld [vmem:[#allocation11 + $0x130] sm:$0xff] }
 0x22a   :  { %v909_v26 = vld [vmem:[#allocation8 + $0xb38] sm:$0xff]  ;;  %v908_v32 = vld [vmem:[#allocation8 + $0xb30] sm:$0xff] }
 0x22b   :  { %2675 = vmatpush1.bf16.msra.mxu1 %v2674_v40  ;;  %2795 = vmatpush1.bf16.msra.mxu0 %v2794_v9  ;;  %v1688_v40 = vld [vmem:[#allocation11 + $0xc0] sm:$0xff]  ;;  %v1693_v9 = vld [vmem:[#allocation11 + $0xe8] sm:$0xff]  ;;  %v2708_v33 = vpack.c.bf16 %v909_v26, %v905_v20  ;;  %v913_v24 = vld [vmem:[#allocation8 + $0xb58] sm:$0xff] }
 0x22c   :  { %2677 = vmatprep.subr.bf16.mxu1 %v2676_v42  ;;  %2797 = vmatprep.subr.bf16.mxu0 %v2796_v45  ;;  %v1695_v42 = vld [vmem:[#allocation11 + $0xf8] sm:$0xff]  ;;  %v880_v45 = vld [vmem:[#allocation8 + $0xa50] sm:$0xff]  ;;  %v2814_v48 = vpack.c.bf16 %v1690_v25, %v1688_v40 }
 0x22d   :  { %v2816_v50 = vpack.c.bf16 %v1695_v42, %v1693_v9  ;;  %v2698_v58 = vpack.c.bf16 %v884_v46, %v880_v45  ;;  %v1706_v35 = vld [vmem:[#allocation11 + $0x150] sm:$0xff] }
 0x22e   :  { %v917_v36 = vld [vmem:[#allocation8 + $0xb78] sm:$0xff]  ;;  %v916_v40 = vld [vmem:[#allocation8 + $0xb70] sm:$0xff] }
 0x22f   :  { %2679 = vmatpush1.bf16.msra.mxu1 %v2678_v51  ;;  %2799 = vmatpush1.bf16.msra.mxu0 %v2798_v55  ;;  %v1692_v51 = vld [vmem:[#allocation11 + $0xe0] sm:$0xff]  ;;  %v1697_v55 = vld [vmem:[#allocation11 + $0x108] sm:$0xff]  ;;  %v2712_v41 = vpack.c.bf16 %v917_v36, %v913_v24  ;;  %v921_v9 = vld [vmem:[#allocation8 + $0xb98] sm:$0xff] }
 0x230   :  { %2681 = vmatprep.subr.bf16.mxu1 %v2680_v56  ;;  %2801 = vmatprep.subr.bf16.mxu0 %v2800_v59  ;;  %v1699_v56 = vld [vmem:[#allocation11 + $0x118] sm:$0xff]  ;;  %v888_v59 = vld [vmem:[#allocation8 + $0xa90] sm:$0xff]  ;;  %v2818_v4 = vpack.c.bf16 %v1694_v53, %v1692_v51 }
 0x231   :  { %v2820_v8 = vpack.c.bf16 %v1699_v56, %v1697_v55  ;;  %v2702_v16 = vpack.c.bf16 %v892_v1, %v888_v59  ;;  %v1710_v45 = vld [vmem:[#allocation11 + $0x170] sm:$0xff] }
 0x232   :  { %v925_v46 = vld [vmem:[#allocation8 + $0xbb8] sm:$0xff]  ;;  %v924_v51 = vld [vmem:[#allocation8 + $0xbb0] sm:$0xff] }
 0x233   :  { %2683 = vmatpush1.bf16.msra.mxu1 %v2682_v10  ;;  %2803 = vmatpush1.bf16.msra.mxu0 %v2802_v14  ;;  %v1696_v10 = vld [vmem:[#allocation11 + $0x100] sm:$0xff]  ;;  %v1701_v14 = vld [vmem:[#allocation11 + $0x128] sm:$0xff]  ;;  %v2716_v54 = vpack.c.bf16 %v925_v46, %v921_v9  ;;  %v929_v55 = vld [vmem:[#allocation8 + $0xbd8] sm:$0xff] }
 0x234   :  { %2685 = vmatprep.subr.bf16.mxu1 %v2684_v15  ;;  %2805 = vmatprep.subr.bf16.mxu0 %v2804_v17  ;;  %v1703_v15 = vld [vmem:[#allocation11 + $0x138] sm:$0xff]  ;;  %v896_v17 = vld [vmem:[#allocation8 + $0xad0] sm:$0xff]  ;;  %v2822_v18 = vpack.c.bf16 %v1698_v12, %v1696_v10 }
 0x235   :  { %v2824_v21 = vpack.c.bf16 %v1703_v15, %v1701_v14  ;;  %v2706_v28 = vpack.c.bf16 %v900_v3, %v896_v17  ;;  %v1714_v59 = vld [vmem:[#allocation11 + $0x190] sm:$0xff]  ;;  %v1716_v15 = vld [vmem:[#allocation11 + $0x1a0] sm:$0xff] }
 0x236   :  { %v933_v1 = vld [vmem:[#allocation8 + $0xbf8] sm:$0xff]  ;;  %v932_v13 = vld [vmem:[#allocation8 + $0xbf0] sm:$0xff] }
 0x237   :  { %2687 = vmatpush1.bf16.msra.mxu1 %v2686_v22  ;;  %2807 = vmatpush1.bf16.msra.mxu0 %v2806_v27  ;;  %v1700_v22 = vld [vmem:[#allocation11 + $0x120] sm:$0xff]  ;;  %v1705_v27 = vld [vmem:[#allocation11 + $0x148] sm:$0xff]  ;;  %v2720_v12 = vpack.c.bf16 %v933_v1, %v929_v55  ;;  %v937_v17 = vld [vmem:[#allocation8 + $0xc18] sm:$0xff] }
 0x238   :  { %2689 = vmatprep.subr.bf16.mxu1 %v2688_v47  ;;  %2809 = vmatprep.subr.bf16.mxu0 %v2808_v30  ;;  %v1707_v47 = vld [vmem:[#allocation11 + $0x158] sm:$0xff]  ;;  %v904_v30 = vld [vmem:[#allocation8 + $0xb10] sm:$0xff]  ;;  %v2826_v62 = vpack.c.bf16 %v1702_v23, %v1700_v22 }
 0x239   :  { %v2828_v2 = vpack.c.bf16 %v1707_v47, %v1705_v27  ;;  %v2710_v29 = vpack.c.bf16 %v908_v32, %v904_v30  ;;  %v941_v3 = vld [vmem:[#allocation8 + $0xc38] sm:$0xff]  ;;  %v940_v22 = vld [vmem:[#allocation8 + $0xc30] sm:$0xff] }
 0x23a   :  { %v2724_v20 = vpack.c.bf16 %v941_v3, %v937_v17  ;;  %v945_v23 = vld [vmem:[#allocation8 + $0xc58] sm:$0xff]  ;;  %v948_v30 = vld [vmem:[#allocation8 + $0xc70] sm:$0xff] }
 0x23b   :  { %2691 = vmatpush1.bf16.msra.mxu1 %v2690_v34  ;;  %2811 = vmatpush1.bf16.msra.mxu0 %v2810_v37  ;;  %v1704_v34 = vld [vmem:[#allocation11 + $0x140] sm:$0xff]  ;;  %v1709_v37 = vld [vmem:[#allocation11 + $0x168] sm:$0xff]  ;;  %v949_v26 = vld [vmem:[#allocation8 + $0xc78] sm:$0xff] }
 0x23c   :  { %2693 = vmatprep.subr.bf16.mxu1 %v2692_v38  ;;  %2813 = vmatprep.subr.bf16.mxu0 %v2812_v39  ;;  %v1711_v38 = vld [vmem:[#allocation11 + $0x178] sm:$0xff]  ;;  %v912_v39 = vld [vmem:[#allocation8 + $0xb50] sm:$0xff]  ;;  %v2830_v25 = vpack.c.bf16 %v1706_v35, %v1704_v34  ;;  %v2728_v47 = vpack.c.bf16 %v949_v26, %v945_v23 }
 0x23d   :  { %v2832_v42 = vpack.c.bf16 %v1711_v38, %v1709_v37  ;;  %v2714_v49 = vpack.c.bf16 %v916_v40, %v912_v39  ;;  %v953_v32 = vld [vmem:[#allocation8 + $0xc98] sm:$0xff]  ;;  %v956_v34 = vld [vmem:[#allocation8 + $0xcb0] sm:$0xff] }
 0x23e   :  { %v961_v35 = vld [vmem:[#allocation8 + $0xcd8] sm:$0xff]  ;;  %v964_v39 = vld [vmem:[#allocation8 + $0xcf0] sm:$0xff] }
 0x23f   :  { %2695 = vmatpush1.bf16.msra.mxu1 %v2694_v44  ;;  %2815 = vmatpush1.bf16.msra.mxu0 %v2814_v48  ;;  %v1708_v44 = vld [vmem:[#allocation11 + $0x160] sm:$0xff]  ;;  %v1713_v48 = vld [vmem:[#allocation11 + $0x188] sm:$0xff]  ;;  %v965_v36 = vld [vmem:[#allocation8 + $0xcf8] sm:$0xff] }
 0x240   :  { %2697 = vmatprep.subr.bf16.mxu1 %v2696_v52  ;;  %2817 = vmatprep.subr.bf16.mxu0 %v2816_v50  ;;  %v1715_v52 = vld [vmem:[#allocation11 + $0x198] sm:$0xff]  ;;  %v920_v50 = vld [vmem:[#allocation8 + $0xb90] sm:$0xff]  ;;  %v2834_v53 = vpack.c.bf16 %v1710_v45, %v1708_v44  ;;  %v2736_v38 = vpack.c.bf16 %v965_v36, %v961_v35 }
 0x241   :  { %v2836_v56 = vpack.c.bf16 %v1715_v52, %v1713_v48  ;;  %v2718_v6 = vpack.c.bf16 %v924_v51, %v920_v50  ;;  %v969_v40 = vld [vmem:[#allocation8 + $0xd18] sm:$0xff]  ;;  %v972_v9 = vld [vmem:[#allocation8 + $0xd30] sm:$0xff] }
 0x242   :  { %v981_v44 = vld [vmem:[#allocation8 + $0xd78] sm:$0xff]  ;;  %v976_v48 = vld [vmem:[#allocation8 + $0xd50] sm:$0xff] }
 0x243   :  { %2699 = vmatpush1.bf16.msra.mxu1 %v2698_v58  ;;  %2819 = vmatpush1.bf16.msra.mxu0 %v2818_v4  ;;  %v1712_v58 = vld [vmem:[#allocation11 + $0x180] sm:$0xff]  ;;  %v1717_v4 = vld [vmem:[#allocation11 + $0x1a8] sm:$0xff]  ;;  %v989_v50 = vld [vmem:[#allocation8 + $0xdb8] sm:$0xff] }
 0x244   :  { %2701 = vmatprep.subr.bf16.mxu1 %v2700_v5  ;;  %2821 = vmatprep.subr.bf16.mxu0 %v2820_v8  ;;  %v1719_v5 = vld [vmem:[#allocation11 + $0x1b8] sm:$0xff]  ;;  %v928_v8 = vld [vmem:[#allocation8 + $0xbd0] sm:$0xff]  ;;  %v2838_v10 = vpack.c.bf16 %v1714_v59, %v1712_v58 }
 0x245   :  { %v2840_v14 = vpack.c.bf16 %v1719_v5, %v1717_v4  ;;  %v980_v52 = vld [vmem:[#allocation8 + $0xd70] sm:$0xff]  ;;  %v993_v58 = vld [vmem:[#allocation8 + $0xdd8] sm:$0xff] }
 0x246   :  { %v2746_v51 = vpack.c.bf16 %v980_v52, %v976_v48  ;;  %v988_v55 = vld [vmem:[#allocation8 + $0xdb0] sm:$0xff]  ;;  %v997_v59 = vld [vmem:[#allocation8 + $0xdf8] sm:$0xff] }
 0x247   :  { %2703 = vmatpush1.bf16.msra.mxu1 %v2702_v16  ;;  %2823 = vmatpush1.bf16.msra.mxu0 %v2822_v18  ;;  %v1718_v16 = vld [vmem:[#allocation11 + $0x1b0] sm:$0xff]  ;;  %v2722_v18 = vpack.c.bf16 %v932_v13, %v928_v8  ;;  %v2752_v5 = vpack.c.bf16 %v997_v59, %v993_v58 }
 0x248   :  { %2705 = vmatprep.subr.bf16.mxu1 %v2704_v19  ;;  %2825 = vmatprep.subr.bf16.mxu0 %v2824_v21  ;;  %v2842_v19 = vpack.c.bf16 %v1718_v16, %v1716_v15  ;;  %v936_v21 = vld [vmem:[#allocation8 + $0xc10] sm:$0xff]  ;;  %v1723_v16 = vld [vmem:[#allocation11 + $0x1d8] sm:$0xff] }
 0x249   :  { %v2726_v27 = vpack.c.bf16 %v940_v22, %v936_v21  ;;  %v996_v8 = vld [vmem:[#allocation8 + $0xdf0] sm:$0xff]  ;;  %v1009_v21 = vld [vmem:[#allocation8 + $0xe58] sm:$0xff] }
 0x24a   :  { %v1721_v15 = vld [vmem:[#allocation11 + $0x1c8] sm:$0xff]  ;;  %v1013_v22 = vld [vmem:[#allocation8 + $0xe78] sm:$0xff] }
 0x24b   :  { %2707 = vmatpush1.bf16.msra.mxu1 %v2706_v28  ;;  %2827 = vmatpush1.bf16.msra.mxu0 %v2826_v62  ;;  %v944_v28 = vld [vmem:[#allocation8 + $0xc50] sm:$0xff]  ;;  %v957_v62 = vld [vmem:[#allocation8 + $0xcb8] sm:$0xff] }
 0x24c   :  { %2709 = vmatprep.subr.bf16.mxu1 %v2708_v33  ;;  %2829 = vmatprep.subr.bf16.mxu0 %v2828_v2  ;;  %v2730_v33 = vpack.c.bf16 %v948_v30, %v944_v28  ;;  %v2732_v24 = vpack.c.bf16 %v957_v62, %v953_v32  ;;  %v952_v2 = vld [vmem:[#allocation8 + $0xc90] sm:$0xff]  ;;  %v1727_v28 = vld [vmem:[#allocation11 + $0x1f8] sm:$0xff]  ;;  %v2760_v30 = vpack.c.bf16 %v1013_v22, %v1009_v21 }
 0x24d   :  { %v2734_v37 = vpack.c.bf16 %v956_v34, %v952_v2  ;;  %v1004_v3 = vld [vmem:[#allocation8 + $0xe30] sm:$0xff]  ;;  %v1017_v2 = vld [vmem:[#allocation8 + $0xe98] sm:$0xff] }
 0x24e   :  { %v1012_v32 = vld [vmem:[#allocation8 + $0xe70] sm:$0xff]  ;;  %v1021_v34 = vld [vmem:[#allocation8 + $0xeb8] sm:$0xff] }
 0x24f   :  { %2711 = vmatpush1.bf16.msra.mxu1 %v2710_v29  ;;  %2831 = vmatpush1.bf16.msra.mxu0 %v2830_v25  ;;  %v960_v29 = vld [vmem:[#allocation8 + $0xcd0] sm:$0xff]  ;;  %v973_v25 = vld [vmem:[#allocation8 + $0xd38] sm:$0xff] }
 0x250   :  { %2713 = vmatprep.subr.bf16.mxu1 %v2712_v41  ;;  %2833 = vmatprep.subr.bf16.mxu0 %v2832_v42  ;;  %v2740_v41 = vpack.c.bf16 %v973_v25, %v969_v40  ;;  %v977_v42 = vld [vmem:[#allocation8 + $0xd58] sm:$0xff]  ;;  %v1729_v25 = vld [vmem:[#allocation11 + $0x208] sm:$0xff] }
 0x251   :  { %v2744_v46 = vpack.c.bf16 %v981_v44, %v977_v42  ;;  %v1029_v40 = vld [vmem:[#allocation8 + $0xef8] sm:$0xff]  ;;  %v1024_v42 = vld [vmem:[#allocation8 + $0xed0] sm:$0xff] }
 0x252   :  { %v1028_v44 = vld [vmem:[#allocation8 + $0xef0] sm:$0xff] }
 0x253   :  { %2715 = vmatpush1.bf16.msra.mxu1 %v2714_v49  ;;  %2835 = vmatpush1.bf16.msra.mxu0 %v2834_v53  ;;  %v985_v49 = vld [vmem:[#allocation8 + $0xd98] sm:$0xff]  ;;  %v2770_v48 = vpack.c.bf16 %v1028_v44, %v1024_v42  ;;  %v1040_v58 = vld [vmem:[#allocation8 + $0xf50] sm:$0xff]  ;;  %v1740_v42 = vld [vmem:[#allocation11 + $0x260] sm:$0xff] }
 0x254   :  { %2717 = vmatprep.subr.bf16.mxu1 %v2716_v54  ;;  %2837 = vmatprep.subr.bf16.mxu0 %v2836_v56  ;;  %v2748_v53 = vpack.c.bf16 %v989_v50, %v985_v49  ;;  %v984_v54 = vld [vmem:[#allocation8 + $0xd90] sm:$0xff] }
 0x255   :  { %v2750_v4 = vpack.c.bf16 %v988_v55, %v984_v54  ;;  %v1032_v49 = vld [vmem:[#allocation8 + $0xf10] sm:$0xff] }
 0x256   :  { %v1036_v50 = vld [vmem:[#allocation8 + $0xf30] sm:$0xff] }
 0x257   :  { %2719 = vmatpush1.bf16.msra.mxu1 %v2718_v6  ;;  %2839 = vmatpush1.bf16.msra.mxu0 %v2838_v10  ;;  %v992_v6 = vld [vmem:[#allocation8 + $0xdd0] sm:$0xff]  ;;  %v1001_v10 = vld [vmem:[#allocation8 + $0xe18] sm:$0xff]  ;;  %v2774_v54 = vpack.c.bf16 %v1036_v50, %v1032_v49  ;;  %v1744_v49 = vld [vmem:[#allocation11 + $0x280] sm:$0xff] }
 0x258   :  { %2721 = vmatprep.subr.bf16.mxu1 %v2720_v12  ;;  %2841 = vmatprep.subr.bf16.mxu0 %v2840_v14  ;;  %v1005_v12 = vld [vmem:[#allocation8 + $0xe38] sm:$0xff]  ;;  %v2754_v13 = vpack.c.bf16 %v996_v8, %v992_v6  ;;  %v1000_v14 = vld [vmem:[#allocation8 + $0xe10] sm:$0xff] }
 0x259   :  { %v2756_v17 = vpack.c.bf16 %v1005_v12, %v1001_v10  ;;  %v2758_v26 = vpack.c.bf16 %v1004_v3, %v1000_v14  ;;  %v1044_v59 = vld [vmem:[#allocation8 + $0xf70] sm:$0xff]  ;;  %v1061_v14 = vld [vmem:[#allocation8 + $0xff8] sm:$0xff] }
 0x25a   :  { %v2778_v6 = vpack.c.bf16 %v1044_v59, %v1040_v58  ;;  %v1048_v10 = vld [vmem:[#allocation8 + $0xf90] sm:$0xff]  ;;  %v1748_v58 = vld [vmem:[#allocation11 + $0x2a0] sm:$0xff] }
 0x25b   :  { %2723 = vmatpush1.bf16.msra.mxu1 %v2722_v18  ;;  %2843 = vmatpush1.bf16.msra.mxu0 %v2842_v19  ;;  %v2844_v18 = vpack.c.bf16 %v1723_v16, %v1721_v15  ;;  %v1720_v19 = vld [vmem:[#allocation11 + $0x1c0] sm:$0xff]  ;;  %v1052_v12 = vld [vmem:[#allocation8 + $0xfb0] sm:$0xff] }
 0x25c   :  { %2725 = vmatprep.subr.bf16.mxu1 %v2724_v20  ;;  %v1722_v20 = vld [vmem:[#allocation11 + $0x1d0] sm:$0xff]  ;;  %v2782_v15 = vpack.c.bf16 %v1052_v12, %v1048_v10  ;;  %v1752_v10 = vld [vmem:[#allocation11 + $0x2c0] sm:$0xff] }
 0x25d   :  { %v2846_v23 = vpack.c.bf16 %v1722_v20, %v1720_v19  ;;  %2845 = vmatprep.subr.bf16.mxu0 %v2844_v18  ;;  %v1060_v3 = vld [vmem:[#allocation8 + $0xff0] sm:$0xff]  ;;  %v3545_v19 = vld [vmem:[#allocation10] sm:$0xf] }
 0x25e   :  { %1575 = vmatmul.mubr.f32.vlgmr.msra.gmra.mrb[8].mxu1 %v3525_v43  ;;  %v2738_v43 = vpack.c.bf16 %v964_v39, %v960_v29  ;;  %v1020_v29 = vld [vmem:[#allocation8 + $0xeb0] sm:$0xff]  ;;  %v1025_v39 = vld [vmem:[#allocation8 + $0xed8] sm:$0xff]  ;;  %v1067_v20 = vrot.slane %v3545_v19, %v3478_v61  ;;  %v1071_v21 = vrot.slane %v3545_v19, %v3483_v63 }
 0x25f   :  { %2727 = vmatpush1.bf16.msra.mxu1 %v2726_v27  ;;  %1645 = vmatprep.mubr.f32.mxu1 %v3528_v57  ;;  %v968_v57 = vld [vmem:[#allocation8 + $0xd10] sm:$0xff] }
 0x260   :  { %2729 = vmatprep.subr.bf16.mxu1 %v2728_v47  ;;  %v2742_v45 = vpack.c.bf16 %v972_v9, %v968_v57  ;;  %v1008_v27 = vld [vmem:[#allocation8 + $0xe50] sm:$0xff]  ;;  %2847 = vmatpush1.bf16.msra.mxu0 %v2846_v23  ;;  %v2768_v9 = vpack.c.bf16 %v1029_v40, %v1025_v39  ;;  %v1736_v40 = vld [vmem:[#allocation11 + $0x240] sm:$0xff] }
 0x261   :  { %v1725_v47 = vld [vmem:[#allocation11 + $0x1e8] sm:$0xff]  ;;  %v2762_v36 = vpack.c.bf16 %v1012_v32, %v1008_v27  ;;  %v1730_v32 = vld [vmem:[#allocation11 + $0x210] sm:$0xff] }
 0x262   :  { %v2848_v62 = vpack.c.bf16 %v1727_v28, %v1725_v47  ;;  %v1742_v44 = vld [vmem:[#allocation11 + $0x270] sm:$0xff] }
 0x263   :  { %2731 = vmatpush1.bf16.msra.mxu1 %v2730_v33  ;;  %v1724_v33 = vld [vmem:[#allocation11 + $0x1e0] sm:$0xff]  ;;  %v1746_v50 = vld [vmem:[#allocation11 + $0x290] sm:$0xff] }
 0x264   :  { %2733 = vmatprep.subr.bf16.mxu1 %v2732_v24  ;;  %v1726_v24 = vld [vmem:[#allocation11 + $0x1f0] sm:$0xff]  ;;  %2849 = vmatprep.subr.bf16.mxu0 %v2848_v62 }
 0x265   :  { %v2850_v35 = vpack.c.bf16 %v1726_v24, %v1724_v33  ;;  %v1735_v33 = vld [vmem:[#allocation11 + $0x238] sm:$0xff]  ;;  %v1750_v59 = vld [vmem:[#allocation11 + $0x2b0] sm:$0xff] }
 0x266   :  { %v1754_v12 = vld [vmem:[#allocation11 + $0x2d0] sm:$0xff] }
 0x267   :  { %2735 = vmatpush1.bf16.msra.mxu1 %v2734_v37  ;;  %2851 = vmatpush1.bf16.msra.mxu0 %v2850_v35  ;;  %v2764_v37 = vpack.c.bf16 %v1021_v34, %v1017_v2 }
 0x268   :  { %2737 = vmatprep.subr.bf16.mxu1 %v2736_v38  ;;  %v1016_v38 = vld [vmem:[#allocation8 + $0xe90] sm:$0xff] }
 0x269   :  { %v2766_v57 = vpack.c.bf16 %v1020_v29, %v1016_v38  ;;  %v1739_v38 = vld [vmem:[#allocation11 + $0x258] sm:$0xff] }
 0x26b   :  { %2739 = vmatpush1.bf16.msra.mxu1 %v2738_v43  ;;  %v1731_v43 = vld [vmem:[#allocation11 + $0x218] sm:$0xff] }
 0x26c   :  { %2741 = vmatprep.subr.bf16.mxu1 %v2740_v41  ;;  %v2852_v41 = vpack.c.bf16 %v1731_v43, %v1729_v25  ;;  %v1738_v25 = vld [vmem:[#allocation11 + $0x250] sm:$0xff]  ;;  %v1741_v43 = vld [vmem:[#allocation11 + $0x268] sm:$0xff] }
 0x26e   :  { %2853 = vmatprep.subr.bf16.mxu0 %v2852_v41  ;;  %v1743_v41 = vld [vmem:[#allocation11 + $0x278] sm:$0xff] }
 0x26f   :  { %2743 = vmatpush1.bf16.msra.mxu1 %v2742_v45  ;;  %v1033_v45 = vld [vmem:[#allocation8 + $0xf18] sm:$0xff] }
 0x270   :  { %2745 = vmatprep.subr.bf16.mxu1 %v2744_v46  ;;  %v1037_v46 = vld [vmem:[#allocation8 + $0xf38] sm:$0xff] }
 0x271   :  { %v3540_v56 = vpop.f32.mrb[6].mxu1  ;;  %v2772_v52 = vpack.c.bf16 %v1037_v46, %v1033_v45  ;;  %v1745_v45 = vld [vmem:[#allocation11 + $0x288] sm:$0xff]  ;;  %v1747_v46 = vld [vmem:[#allocation11 + $0x298] sm:$0xff] }
 0x272   :  { %v3542_v1 = vpop.f32.mrb[7].mxu1  ;;  %v1151_v22 = vadd.f32 %v3540_v56, %v1067_v20  ;;  %v1763_v20 = vld [vmem:[#allocation11 + $0x318] sm:$0xff] }
 0x273   :  { %2747 = vmatpush1.bf16.msra.mxu1 %v2746_v51  ;;  %v1041_v51 = vld [vmem:[#allocation8 + $0xf58] sm:$0xff]  ;;  %v1153_v23 = vadd.f32 %v3542_v1, %v1071_v21  ;;  %v1737_v1 = vld [vmem:[#allocation11 + $0x248] sm:$0xff] }
 0x274   :  { %2749 = vmatprep.subr.bf16.mxu1 %v2748_v53  ;;  %v1045_v53 = vld [vmem:[#allocation8 + $0xf78] sm:$0xff]  ;;  %v2860_v39 = vpack.c.bf16 %v1739_v38, %v1737_v1  ;;  %v1772_v38 = vld [vmem:[#allocation11 + $0x360] sm:$0xff] }
 0x275   :  { %v2776_v55 = vpack.c.bf16 %v1045_v53, %v1041_v51  ;;  %v1749_v51 = vld [vmem:[#allocation11 + $0x2a8] sm:$0xff]  ;;  %v1751_v53 = vld [vmem:[#allocation11 + $0x2b8] sm:$0xff] }
 0x277   :  { %2751 = vmatpush1.bf16.msra.mxu1 %v2750_v4  ;;  %v1049_v4 = vld [vmem:[#allocation8 + $0xf98] sm:$0xff] }
 0x278   :  { %2753 = vmatprep.subr.bf16.mxu1 %v2752_v5  ;;  %v1053_v5 = vld [vmem:[#allocation8 + $0xfb8] sm:$0xff] }
 0x279   :  { %v2780_v8 = vpack.c.bf16 %v1053_v5, %v1049_v4  ;;  %v1753_v4 = vld [vmem:[#allocation11 + $0x2c8] sm:$0xff]  ;;  %v1755_v5 = vld [vmem:[#allocation11 + $0x2d8] sm:$0xff] }
 0x27b   :  { %2755 = vmatpush1.bf16.msra.mxu1 %v2754_v13  ;;  %v1057_v13 = vld [vmem:[#allocation8 + $0xfd8] sm:$0xff] }
 0x27c   :  { %2757 = vmatprep.subr.bf16.mxu1 %v2756_v17  ;;  %v2784_v16 = vpack.c.bf16 %v1061_v14, %v1057_v13  ;;  %v1056_v17 = vld [vmem:[#allocation8 + $0xfd0] sm:$0xff]  ;;  %v1759_v14 = vld [vmem:[#allocation11 + $0x2f8] sm:$0xff] }
 0x27d   :  { %v2786_v18 = vpack.c.bf16 %v1060_v3, %v1056_v17  ;;  %v1757_v13 = vld [vmem:[#allocation11 + $0x2e8] sm:$0xff]  ;;  %v1756_v17 = vld [vmem:[#allocation11 + $0x2e0] sm:$0xff]  ;;  %v1758_v3 = vld [vmem:[#allocation11 + $0x2f0] sm:$0xff] }
 0x27e   :  { %v2882_v21 = vpack.c.bf16 %v1758_v3, %v1756_v17 }
 0x27f   :  { %2759 = vmatpush1.bf16.msra.mxu1 %v2758_v26 }
 0x280   :  { %2761 = vmatprep.subr.bf16.mxu1 %v2760_v30  ;;  %v1728_v30 = vld [vmem:[#allocation11 + $0x200] sm:$0xff] }
 0x281   :  { %v2854_v2 = vpack.c.bf16 %v1730_v32, %v1728_v30  ;;  %v1764_v32 = vld [vmem:[#allocation11 + $0x320] sm:$0xff] }
 0x283   :  { %2763 = vmatpush1.bf16.msra.mxu1 %v2762_v36  ;;  %v1732_v36 = vld [vmem:[#allocation11 + $0x220] sm:$0xff] }
 0x284   :  { %2765 = vmatprep.subr.bf16.mxu1 %v2764_v37  ;;  %v1734_v37 = vld [vmem:[#allocation11 + $0x230] sm:$0xff] }
 0x285   :  { %v2858_v29 = vpack.c.bf16 %v1734_v37, %v1732_v36  ;;  %v1773_v36 = vld [vmem:[#allocation11 + $0x368] sm:$0xff]  ;;  %v1775_v37 = vld [vmem:[#allocation11 + $0x378] sm:$0xff] }
 0x286   :  { %v2896_v1 = vpack.c.bf16 %v1775_v37, %v1773_v36  ;;  %v1958_v37 = vld [vmem:[%s3677_s7 + $0x30] sm:$0xff] }
 0x287   :  { %2767 = vmatpush1.bf16.msra.mxu1 %v2766_v57  ;;  %v2862_v57 = vpack.c.bf16 %v1738_v25, %v1736_v40  ;;  %v1779_v40 = vld [vmem:[#allocation11 + $0x398] sm:$0xff] }
 0x288   :  { %2769 = vmatprep.subr.bf16.mxu1 %v2768_v9  ;;  %v2864_v9 = vpack.c.bf16 %v1743_v41, %v1741_v43  ;;  %v1776_v41 = vld [vmem:[#allocation11 + $0x380] sm:$0xff] }
 0x28b   :  { %2771 = vmatpush1.bf16.msra.mxu1 %v2770_v48  ;;  %v2866_v48 = vpack.c.bf16 %v1742_v44, %v1740_v42  ;;  %v1783_v42 = vld [vmem:[#allocation11 + $0x3b8] sm:$0xff] }
 0x28c   :  { %2773 = vmatprep.subr.bf16.mxu1 %v2772_v52  ;;  %v2868_v52 = vpack.c.bf16 %v1747_v46, %v1745_v45  ;;  %v1780_v46 = vld [vmem:[#allocation11 + $0x3a0] sm:$0xff] }
 0x28f   :  { %2775 = vmatpush1.bf16.msra.mxu1 %v2774_v54  ;;  %v2870_v54 = vpack.c.bf16 %v1746_v50, %v1744_v49  ;;  %v1787_v49 = vld [vmem:[#allocation11 + $0x3d8] sm:$0xff] }
 0x290   :  { %2777 = vmatprep.subr.bf16.mxu1 %v2776_v55  ;;  %v2872_v55 = vpack.c.bf16 %v1751_v53, %v1749_v51  ;;  %v1784_v53 = vld [vmem:[#allocation11 + $0x3c0] sm:$0xff] }
 0x293   :  { %2779 = vmatpush1.bf16.msra.mxu1 %v2778_v6  ;;  %v2874_v6 = vpack.c.bf16 %v1750_v59, %v1748_v58  ;;  %v1791_v58 = vld [vmem:[#allocation11 + $0x3f8] sm:$0xff] }
 0x294   :  { %2781 = vmatprep.subr.bf16.mxu1 %v2780_v8  ;;  %v2876_v8 = vpack.c.bf16 %v1755_v5, %v1753_v4  ;;  %v1788_v5 = vld [vmem:[#allocation11 + $0x3e0] sm:$0xff] }
 0x297   :  { %2783 = vmatpush1.bf16.msra.mxu1 %v2782_v15  ;;  %v2878_v15 = vpack.c.bf16 %v1754_v12, %v1752_v10  ;;  %v1969_v10 = vld [vmem:[%s3677_s7 + $0x88] sm:$0xff] }
 0x298   :  { %2785 = vmatprep.subr.bf16.mxu1 %v2784_v16  ;;  %v2880_v16 = vpack.c.bf16 %v1759_v14, %v1757_v13  ;;  %v1075_v14 = vrot.slane %v3545_v19, %v208_v7  ;;  %v1970_v7 = vld [vmem:[%s3677_s7 + $0x90] sm:$0xff] }
 0x29b   :  { %2787 = vmatpush1.bf16.msra.mxu1 %v2786_v18  ;;  %v1761_v18 = vld [vmem:[#allocation11 + $0x308] sm:$0xff] }
 0x29e   :  { %1646 = vmatmul.mubr.f32.vlgmr.msra.gmra.mrb[8].mxu1 %v3535_v31  ;;  %v1733_v31 = vld [vmem:[#allocation11 + $0x228] sm:$0xff] }
 0x29f   :  { %v2856_v35 = vpack.c.bf16 %v1735_v33, %v1733_v31  ;;  %v1769_v31 = vld [vmem:[#allocation11 + $0x348] sm:$0xff]  ;;  %v1771_v33 = vld [vmem:[#allocation11 + $0x358] sm:$0xff]  ;;  %2241 = vmatprep.mubr.msk.f32.mxu1 %vm3279_vm15, %v3277_v0 }
 0x2f9   :  { %v1363_v26 = vpop.f32.mrb[2].mxu0 }
 0x2fa   :  { %v2961_v27 = vadd.f32 %v1363_v26, %v1151_v22  ;;  %v1365_v47 = vpop.f32.mrb[3].mxu0  ;;  %v2884_v22 = vpack.c.bf16 %v1763_v20, %v1761_v18  ;;  %v1762_v26 = vld [vmem:[#allocation11 + $0x310] sm:$0xff] }
 0x2fb   :  { %v2963_v28 = vadd.f32 %v1365_v47, %v1153_v23  ;;  %v1760_v23 = vld [vmem:[#allocation11 + $0x300] sm:$0xff]  ;;  %v1767_v47 = vld [vmem:[#allocation11 + $0x338] sm:$0xff]  ;;  %v1952_v20 = vld [vmem:[%s3677_s7] sm:$0xff] }
 0x2fc   :  { %v1656_v62 = vmul.f32 0.01, %v2961_v27  ;;  %vm1652_vm9 = vcmp.gt.f32.partialorder %v2961_v27, 0.0 }
 0x2fd   :  { %v1657_v24 = vmul.f32 0.01, %v2963_v28  ;;  %vm1653_vm10 = vcmp.gt.f32.partialorder %v2963_v28, 0.0 }
 0x2fe   :  { %v1660_v56 = vsel %vm1652_vm9, %v2961_v27, %v1656_v62  ;;  %v1765_v27 = vld [vmem:[#allocation11 + $0x328] sm:$0xff]  ;;  %v1766_v62 = vld [vmem:[#allocation11 + $0x330] sm:$0xff] }
 0x2ff   :  { %v1661_v34 = vsel %vm1653_vm10, %v2963_v28, %v1657_v24  ;;  %v2886_v28 = vpack.c.bf16 %v1762_v26, %v1760_v23  ;;  %v2888_v30 = vpack.c.bf16 %v1767_v47, %v1765_v27  ;;  %v2890_v24 = vpack.c.bf16 %v1766_v62, %v1764_v32  ;;  %v1954_v27 = vld [vmem:[%s3677_s7 + $0x10] sm:$0xff]  ;;  %v1955_v47 = vld [vmem:[%s3677_s7 + $0x18] sm:$0xff]  ;;  %v1973_v32 = vld [vmem:[%s3677_s7 + $0xa8] sm:$0xff] }
 0x300   :  { %1868 = vmatprep.mubr.f32.mxu0 %v1661_v34  ;;  %v1768_v34 = vld [vmem:[#allocation11 + $0x340] sm:$0xff]  ;;  %v2920_v26 = vpack.c.bf16 %v1971_v60, %v1970_v7  ;;  %v2922_v62 = vpack.c.bf16 %v1955_v47, %v1954_v27 }
 0x301   :  { %1869 = vmatmul.mubr.f32.vlgmr.msra.gmra.mrb[4].mxu0 %v1660_v56  ;;  %v2071_v27 = vld [vmem:[#allocation16 + $0x38] sm:$0xff] }
 0x302   :  { %2855 = vmatpush1.bf16.msra.mxu0 %v2854_v2  ;;  %v2892_v2 = vpack.c.bf16 %v1771_v33, %v1769_v31  ;;  %v1956_v33 = vld [vmem:[%s3677_s7 + $0x20] sm:$0xff] }
 0x303   :  { %2857 = vmatprep.subr.bf16.mxu0 %v2856_v35  ;;  %v1770_v35 = vld [vmem:[#allocation11 + $0x350] sm:$0xff] }
 0x304   :  { %v2894_v56 = vpack.c.bf16 %v1770_v35, %v1768_v34  ;;  %v1975_v34 = vld [vmem:[%s3677_s7 + $0xb8] sm:$0xff] }
 0x306   :  { %2859 = vmatpush1.bf16.msra.mxu0 %v2858_v29  ;;  %v1774_v29 = vld [vmem:[#allocation11 + $0x370] sm:$0xff] }
 0x307   :  { %2861 = vmatprep.subr.bf16.mxu0 %v2860_v39  ;;  %v1777_v39 = vld [vmem:[#allocation11 + $0x388] sm:$0xff]  ;;  %v2898_v25 = vpack.c.bf16 %v1774_v29, %v1772_v38  ;;  %v1977_v38 = vld [vmem:[%s3677_s7 + $0xc8] sm:$0xff] }
 0x308   :  { %v2900_v43 = vpack.c.bf16 %v1779_v40, %v1777_v39  ;;  %v1960_v40 = vld [vmem:[%s3677_s7 + $0x40] sm:$0xff] }
 0x30a   :  { %2863 = vmatpush1.bf16.msra.mxu0 %v2862_v57  ;;  %v1778_v57 = vld [vmem:[#allocation11 + $0x390] sm:$0xff] }
 0x30b   :  { %2865 = vmatprep.subr.bf16.mxu0 %v2864_v9  ;;  %v1781_v9 = vld [vmem:[#allocation11 + $0x3a8] sm:$0xff]  ;;  %v2902_v44 = vpack.c.bf16 %v1778_v57, %v1776_v41 }
 0x30c   :  { %v2904_v45 = vpack.c.bf16 %v1783_v42, %v1781_v9  ;;  %v1979_v41 = vld [vmem:[%s3677_s7 + $0xd8] sm:$0xff]  ;;  %v1962_v42 = vld [vmem:[%s3677_s7 + $0x50] sm:$0xff] }
 0x30e   :  { %2867 = vmatpush1.bf16.msra.mxu0 %v2866_v48  ;;  %v1782_v48 = vld [vmem:[#allocation11 + $0x3b0] sm:$0xff] }
 0x30f   :  { %2869 = vmatprep.subr.bf16.mxu0 %v2868_v52  ;;  %v1785_v52 = vld [vmem:[#allocation11 + $0x3c8] sm:$0xff]  ;;  %v2906_v50 = vpack.c.bf16 %v1782_v48, %v1780_v46  ;;  %v1981_v48 = vld [vmem:[%s3677_s7 + $0xe8] sm:$0xff] }
 0x310   :  { %v2908_v51 = vpack.c.bf16 %v1787_v49, %v1785_v52  ;;  %v1980_v46 = vld [vmem:[%s3677_s7 + $0xe0] sm:$0xff] }
 0x311   :  { %v2940_v52 = vpack.c.bf16 %v1981_v48, %v1980_v46  ;;  %v1964_v49 = vld [vmem:[%s3677_s7 + $0x60] sm:$0xff] }
 0x312   :  { %2871 = vmatpush1.bf16.msra.mxu0 %v2870_v54  ;;  %v1786_v54 = vld [vmem:[#allocation11 + $0x3d0] sm:$0xff] }
 0x313   :  { %2873 = vmatprep.subr.bf16.mxu0 %v2872_v55  ;;  %v1789_v55 = vld [vmem:[#allocation11 + $0x3e8] sm:$0xff]  ;;  %v2910_v59 = vpack.c.bf16 %v1786_v54, %v1784_v53  ;;  %v1982_v53 = vld [vmem:[%s3677_s7 + $0xf0] sm:$0xff] }
 0x314   :  { %v2912_v4 = vpack.c.bf16 %v1791_v58, %v1789_v55  ;;  %v1983_v54 = vld [vmem:[%s3677_s7 + $0xf8] sm:$0xff]  ;;  %v1966_v58 = vld [vmem:[%s3677_s7 + $0x70] sm:$0xff] }
 0x315   :  { %v2944_v55 = vpack.c.bf16 %v1983_v54, %v1982_v53 }
 0x316   :  { %2875 = vmatpush1.bf16.msra.mxu0 %v2874_v6  ;;  %v1790_v6 = vld [vmem:[#allocation11 + $0x3f0] sm:$0xff] }
 0x317   :  { %2877 = vmatprep.subr.bf16.mxu0 %v2876_v8  ;;  %v1968_v8 = vld [vmem:[%s3677_s7 + $0x80] sm:$0xff]  ;;  %v2914_v12 = vpack.c.bf16 %v1790_v6, %v1788_v5  ;;  %v2064_v5 = vld [vmem:[#allocation16] sm:$0xff] }
 0x318   :  { %v2916_v13 = vpack.c.bf16 %v1969_v10, %v1968_v8  ;;  %v2065_v6 = vld [vmem:[#allocation16 + $0x8] sm:$0xff]  ;;  %v2066_v8 = vld [vmem:[#allocation16 + $0x10] sm:$0xff]  ;;  %v3278_v10 = vmov 0.0|0.0  }
 0x319   :  { %2948 = vmatprep.subr.bf16.mxu1 %v3278_v10 }
 0x31a   :  { %2879 = vmatpush1.bf16.msra.mxu0 %v2878_v15  ;;  %v1079_v15 = vrot.slane %v3545_v19, %v212_v11 }
 0x31b   :  { %2881 = vmatprep.subr.bf16.mxu0 %v2880_v16 }
 0x31e   :  { %2883 = vmatpush1.bf16.msra.mxu0 %v2882_v21  ;;  %v1953_v21 = vld [vmem:[%s3677_s7 + $0x8] sm:$0xff] }
 0x31f   :  { %2885 = vmatprep.subr.bf16.mxu0 %v2884_v22  ;;  %v2918_v19 = vpack.c.bf16 %v1953_v21, %v1952_v20 }
 0x322   :  { %2887 = vmatpush1.bf16.msra.mxu0 %v2886_v28 }
 0x323   :  { %2889 = vmatprep.subr.bf16.mxu0 %v2888_v30  ;;  %v1972_v30 = vld [vmem:[%s3677_s7 + $0xa0] sm:$0xff] }
 0x324   :  { %v2924_v31 = vpack.c.bf16 %v1973_v32, %v1972_v30 }
 0x326   :  { %2891 = vmatpush1.bf16.msra.mxu0 %v2890_v24  ;;  %v1957_v24 = vld [vmem:[%s3677_s7 + $0x28] sm:$0xff] }
 0x327   :  { %2893 = vmatprep.subr.bf16.mxu0 %v2892_v2  ;;  %v1974_v2 = vld [vmem:[%s3677_s7 + $0xb0] sm:$0xff]  ;;  %v2926_v35 = vpack.c.bf16 %v1957_v24, %v1956_v33  ;;  %v2179_v24 = vld [vmem:[#allocation17] ss:$0 sm:$0xff] }
 0x328   :  { %v2928_v36 = vpack.c.bf16 %v1975_v34, %v1974_v2 }
 0x32a   :  { %2895 = vmatpush1.bf16.msra.mxu0 %v2894_v56  ;;  %v1959_v56 = vld [vmem:[%s3677_s7 + $0x38] sm:$0xff] }
 0x32b   :  { %2897 = vmatprep.subr.bf16.mxu0 %v2896_v1  ;;  %v1976_v1 = vld [vmem:[%s3677_s7 + $0xc0] sm:$0xff]  ;;  %v2930_v29 = vpack.c.bf16 %v1959_v56, %v1958_v37 }
 0x32c   :  { %v2932_v39 = vpack.c.bf16 %v1977_v38, %v1976_v1 }
 0x32e   :  { %2899 = vmatpush1.bf16.msra.mxu0 %v2898_v25  ;;  %v1961_v25 = vld [vmem:[%s3677_s7 + $0x48] sm:$0xff] }
 0x32f   :  { %2901 = vmatprep.subr.bf16.mxu0 %v2900_v43  ;;  %v1978_v43 = vld [vmem:[%s3677_s7 + $0xd0] sm:$0xff]  ;;  %v2934_v57 = vpack.c.bf16 %v1961_v25, %v1960_v40 }
 0x330   :  { %v2936_v9 = vpack.c.bf16 %v1979_v41, %v1978_v43 }
 0x332   :  { %2903 = vmatpush1.bf16.msra.mxu0 %v2902_v44  ;;  %v1963_v44 = vld [vmem:[%s3677_s7 + $0x58] sm:$0xff] }
 0x333   :  { %2905 = vmatprep.subr.bf16.mxu0 %v2904_v45  ;;  %v2938_v45 = vpack.c.bf16 %v1963_v44, %v1962_v42 }
 0x336   :  { %2907 = vmatpush1.bf16.msra.mxu0 %v2906_v50  ;;  %v1965_v50 = vld [vmem:[%s3677_s7 + $0x68] sm:$0xff] }
 0x337   :  { %2909 = vmatprep.subr.bf16.mxu0 %v2908_v51  ;;  %v2942_v51 = vpack.c.bf16 %v1965_v50, %v1964_v49 }
 0x33a   :  { %2911 = vmatpush1.bf16.msra.mxu0 %v2910_v59  ;;  %v1967_v59 = vld [vmem:[%s3677_s7 + $0x78] sm:$0xff]  ;;  %s3280_s7 = smov [#allocation19]  }
 0x33b   :  { %2913 = vmatprep.subr.bf16.mxu0 %v2912_v4  ;;  %v2946_v4 = vpack.c.bf16 %v1967_v59, %v1966_v58  ;;  %s2160_s14 = sshll.u32 %s3280_s7, 4  ;;  %s2161_s14 = int_to_ptr.vmem [resolvable:$true] %s2160_s14 }
 0x33c   :  { %s3223_s15 = scalar_lea.vmem %s2161_s14, 128  ;;  %p3228_p11 = scmp.lt.s32.totalorder %s2161_s14, %s2161_s14 }
 0x33d   :  { %p3224_p10 = scmp.ne.s32.totalorder %s2161_s14, %s3223_s15  ;;  %p3229_p12 = scmp.lt.s32.totalorder %s3223_s15, %s3223_s15 }
 0x33e   :  { %2915 = vmatpush1.bf16.msra.mxu0 %v2914_v12  ;;  %v2949_v12 = vpack.c.bf16 %v2065_v6, %v2064_v5 }
 0x33f   :  { %2917 = vmatprep.subr.bf16.mxu0 %v2916_v13  ;;  %v2067_v13 = vld [vmem:[#allocation16 + $0x18] sm:$0xff]  ;;  %p3230_p13 = por %p3229_p12, %p3228_p11 }
 0x340   :  { %2950 = vmatpush3.bf16.msra.mxu1 %v2949_v12 }
 0x341   :  { %2951 = vmatprep.subr.bf16.mxu1 %v3278_v10  ;;  %p3231_p0 = pnand %p3230_p13, %p3224_p10 }
 0x371   :  { %v1647_v16 = vpop.f32.mrb[8].mxu1 }
 0x372   :  { %v2964_v17 = vadd.f32 %v1647_v16, %v1075_v14  ;;  %v1649_v3 = vpop.f32.mrb[9].mxu1  ;;  %v2952_v14 = vpack.c.bf16 %v2067_v13, %v2066_v8 }
 0x373   :  { %v2965_v18 = vadd.f32 %v1649_v3, %v1079_v15  ;;  %v1792_v15 = vld [vmem:[#allocation13] sm:$0x3] }
 0x374   :  { %v1658_v22 = vmul.f32 0.01, %v2964_v17  ;;  %vm1654_vm11 = vcmp.gt.f32.partialorder %v2964_v17, 0.0  ;;  %2953 = vmatpush3.bf16.msra.mxu1 %v2952_v14  ;;  %v1797_v16 = vrot.slane %v1792_v15, %v3478_v61  ;;  %v2070_v61 = vld [vmem:[#allocation16 + $0x30] sm:$0xff] }
 0x375   :  { %v1659_v11 = vmul.f32 0.01, %v2965_v18  ;;  %vm1655_vm12 = vcmp.gt.f32.partialorder %v2965_v18, 0.0  ;;  %2954 = vmatprep.subr.bf16.mxu1 %v3278_v10 }
 0x376   :  { %v1662_v28 = vsel %vm1654_vm11, %v2964_v17, %v1658_v22  ;;  %v1801_v17 = vrot.slane %v1792_v15, %v3483_v63  ;;  %v2958_v63 = vpack.c.bf16 %v2071_v27, %v2070_v61 }
 0x377   :  { %v1663_v23 = vsel %vm1655_vm12, %v2965_v18, %v1659_v11 }
 0x378   :  { %1939 = vmatprep.mubr.f32.mxu0 %v1663_v23  ;;  %v2069_v23 = vld [vmem:[#allocation16 + $0x28] sm:$0xff] }
 0x379   :  { %1940 = vmatmul.mubr.f32.vlgmr.msra.gmra.mrb[4].mxu0 %v1662_v28  ;;  %v2178_v28 = vld [vmem:[#allocation14] ss:$0 sm:$0xff] }
 0x37a   :  { %2919 = vmatpush3.bf16.msra.mxu0 %v2918_v19  ;;  %v2068_v19 = vld [vmem:[#allocation16 + $0x20] sm:$0xff] }
 0x37b   :  { %2921 = vmatprep.subr.bf16.mxu0 %v2920_v26  ;;  %v2955_v26 = vpack.c.bf16 %v2069_v23, %v2068_v19 }
 0x37d   :  { %2956 = vmatpush3.bf16.msra.mxu1 %v2955_v26 }
 0x37e   :  { %2923 = vmatpush3.bf16.msra.mxu0 %v2922_v62  ;;  %2957 = vmatprep.subr.bf16.mxu1 %v3278_v10 }
 0x37f   :  { %2925 = vmatprep.subr.bf16.mxu0 %v2924_v31 }
 0x381   :  { %2959 = vmatpush3.bf16.msra.mxu1 %v2958_v63 }
 0x382   :  { %2927 = vmatpush3.bf16.msra.mxu0 %v2926_v35 }
 0x383   :  { %2929 = vmatprep.subr.bf16.mxu0 %v2928_v36 }
 0x386   :  { %2931 = vmatpush3.bf16.msra.mxu0 %v2930_v29 }
 0x387   :  { %2933 = vmatprep.subr.bf16.mxu0 %v2932_v39 }
 0x38a   :  { %2935 = vmatpush3.bf16.msra.mxu0 %v2934_v57 }
 0x38b   :  { %2937 = vmatprep.subr.bf16.mxu0 %v2936_v9 }
 0x38e   :  { %2939 = vmatpush3.bf16.msra.mxu0 %v2938_v45 }
 0x38f   :  { %2941 = vmatprep.subr.bf16.mxu0 %v2940_v52 }
 0x392   :  { %2943 = vmatpush3.bf16.msra.mxu0 %v2942_v51 }
 0x393   :  { %2945 = vmatprep.subr.bf16.mxu0 %v2944_v55 }
 0x396   :  { %2947 = vmatpush3.bf16.msra.mxu0 %v2946_v4 }
 0x44c   :  { %v1941_v3 = vpop.f32.mrb[4].mxu0 }
 0x44d   :  { %v2966_v18 = vadd.f32 %v1941_v3, %v1797_v16  ;;  %v1943_v20 = vpop.f32.mrb[5].mxu0 }
 0x44e   :  { %v2967_v21 = vadd.f32 %v1943_v20, %v1801_v17 }
 0x44f   :  { %v1948_v22 = vmul.f32 0.01, %v2966_v18  ;;  %vm1946_vm13 = vcmp.gt.f32.partialorder %v2966_v18, 0.0 }
 0x450   :  { %v1949_v7 = vmul.f32 0.01, %v2967_v21  ;;  %vm1947_vm14 = vcmp.gt.f32.partialorder %v2967_v21, 0.0 }
 0x451   :  { %v1950_v11 = vsel %vm1946_vm13, %v2966_v18, %v1948_v22 }
 0x452   :  { %v1951_v60 = vsel %vm1947_vm14, %v2967_v21, %v1949_v7 }
 0x453   :  { %2055 = vmatprep.mubr.f32.mxu0 %v1951_v60 }
 0x454   :  { %2056 = vmatmul.mubr.f32.vlgmr.msra.gmra.mrb[6].mxu0 %v1950_v11 }
 0x527   :  { %v2213_v47 = vpop.f32.mrb[6].mxu0 }
 0x528   :  { %v2214_v30 = vpop.f32.mrb[7].mxu0 }
 0x529   :  { %v2215_v32 = vadd.f32 %v2214_v30, %v2213_v47 }
 0x52b   :  { %v2058_v62 = vadd.f32 %v2215_v32, %v2178_v28 }
 0x52d   :  { %vm2061_vm0 = vcmp.gt.f32.partialorder %v2058_v62, 0.0  ;;  %v2062_v31 = vmul.f32 0.01, %v2058_v62 }
 0x52f   :  { %v2063_v33 = vsel %vm2061_vm0, %v2058_v62, %v2062_v31 }
 0x530   :  { %2242 = vmatmul.mubr.msk.f32.vlgmr.msra.gmra.mrb[10].mxu1 %vm2079_vm1, %v2063_v33 }
 0x603   :  { %v2149_v2 = vpop.f32.mrb[10].mxu1 }
 0x604   :  { %v2150_v34 = vadd.f32 %v2179_v24, %v2149_v2  ;;  %v2243_v35 = vpop.f32.mrb[11].mxu1 }
 0x606   :  { %2153 = vst [vmem:[#allocation19] sm:$0xff] %v2150_v34 }
 0x607   :  { %3234 = shalt.err (!%p3231_p0)
}
 0x608   :  { %s3235_s13 = scalar_lea.hbm %s3681_s11, 128 }
 0x609   :  { %p3236_p1 = scmp.ne.s32.totalorder %s3681_s11, %s3235_s13  ;;  %p3239_p2 = scmp.lt.u32.totalorder %s3235_s13, %s3681_s11 }
 0x60b   :  { %p3241_p3 = pnand %p3239_p2, %p3236_p1 }
 0x60d   :  { %3244 = shalt.err (!%p3241_p3)
}
 0x60e   :  { %2163 = dma.vmem_to_hbm [thread:$0]  %s2161_s14, 128, %s3681_s11, [#allocation4]  }
 0x60f   :  { %3257 = dma.done.wait [#allocation4], 128  }
 0x610   :  { %3258 = vsyncadd [#allocation4], 4294967168 }
 0x611   :  { %2167 = vsyncpa [#allocation3], 1 }
 0x612   :  { %2168 = vsyncpa [#allocation6], 1 }
 0x613   :  { %2169 = vsyncpa [#allocation9], 1 }
 0x614   :  { %2170 = vsyncpa [#allocation12], 1 }
 0x615   :  { %2171 = vsyncpa [#allocation15], 1 }
 0x616   :  { %2172 = vsyncpa [#allocation18], 1 }
 0x617   :  { %2173 = vsyncpa [#allocation4], 1 }

</bundles_post_ra>
